<compile_context>
chip_gen: v7x
topology: tpu7x:2x2x1
jax: 0.10.0
libtpu: 0.0.40
codegen_flags: <defaults>
</compile_context>

<pallas_src>
import functools
import math

import jax
import jax.numpy as jnp
from jax.experimental import pallas as pl
from jax.experimental.pallas import tpu as pltpu

_NEG_INF = -1e30              # finite "-inf" for the additive causal mask
COL_TILE = 512                # lanes per grid step for wide (vocab) outputs
EMBED_ROWS = 16               # rows gathered per embed grid step (unrolled DMAs)


def _tpu_vmem_bytes():
    try:
        info = pltpu.get_tpu_info()
        for name in ("vmem_capacity_bytes", "vmem_size_bytes", "vmem_bytes"):
            v = getattr(info, name, None)
            if v:
                return int(v)
    except Exception:
        pass
    return 64 * 1024 * 1024   # conservative (v7x) fallback


_PHYS_VMEM = _tpu_vmem_bytes()
if _PHYS_VMEM >= 100 * 1024 * 1024:          # v5e / v6e: 128 MiB physical
    _VMEM_LIMIT = 96 * 1024 * 1024
    ROW_TILE = 512
else:                                        # v7x: 64 MiB physical
    _VMEM_LIMIT = 48 * 1024 * 1024
    ROW_TILE = 256


# ----------------------------- helpers ---------------------------------

def _pick_tile(dim, target, quantum):
    """Largest tile <= target that is a multiple of `quantum` and divides dim.
    Falls back to the full dimension (always a legal block size)."""
    if dim <= target:
        return dim
    t = (target // quantum) * quantum
    while t >= quantum:
        if dim % t == 0:
            return t
        t -= quantum
    return dim


def _cparams(semantics):
    return pltpu.CompilerParams(dimension_semantics=tuple(semantics),
                                vmem_limit_bytes=_VMEM_LIMIT)


def _erf(x):
    # Abramowitz & Stegun 7.1.26, |err| < 1.5e-7 -- matches torch's erf GELU.
    a1, a2, a3, a4, a5 = 0.254829592, -0.284496736, 1.421413741, -1.453152027, 1.061405429
    p = 0.3275911
    sign = jnp.where(x >= 0.0, 1.0, -1.0)
    ax = jnp.abs(x)
    t = 1.0 / (1.0 + p * ax)
    poly = ((((a5 * t + a4) * t + a3) * t + a2) * t + a1) * t
    return sign * (1.0 - poly * jnp.exp(-ax * ax))


def _gelu_exact(x):
    return 0.5 * x * (1.0 + _erf(x * (1.0 / math.sqrt(2.0))))


def _layernorm(x, g, b):
    # mean/var always in f32 (x is the f32 residual stream), biased var like torch
    mu = jnp.mean(x, axis=-1, keepdims=True)
    var = jnp.mean(jnp.square(x - mu), axis=-1, keepdims=True)
    return (x - mu) * jax.lax.rsqrt(var + 1e-5) * g + b


# ----------------------------- kernels ---------------------------------

def _embed_kernel(tok_ref, emb_hbm, pe_ref, o_ref, rows, sems, *, scale, tr):
    # Gather `tr` table rows straight from HBM via per-row DMAs (token ids are
    # scalar-prefetched into SMEM), then fuse scale + positional-encoding add.
    base = pl.program_id(0) * tr
    for r in range(tr):                              # unrolled: static dst/sem idx
        tok = tok_ref[base + r]
        pltpu.make_async_copy(emb_hbm.at[tok], rows.at[r], sems.at[r]).start()
    for r in range(tr):
        pltpu.make_async_copy(emb_hbm.at[0], rows.at[r], sems.at[r]).wait()
    o_ref[...] = rows[...] * scale + pe_ref[...]


def _ln_qkv_kernel(x_ref, g_ref, b_ref, wq_ref, bq_ref, wk_ref, bk_ref,
                   wv_ref, bv_ref, q_ref, k_ref, v_ref):
    y = _layernorm(x_ref[...], g_ref[...], b_ref[...]).astype(jnp.bfloat16)
    q_ref[...] = (jnp.dot(y, wq_ref[...], preferred_element_type=jnp.float32)
                  + bq_ref[...]).astype(q_ref.dtype)
    k_ref[...] = (jnp.dot(y, wk_ref[...], preferred_element_type=jnp.float32)
                  + bk_ref[...]).astype(k_ref.dtype)
    v_ref[...] = (jnp.dot(y, wv_ref[...], preferred_element_type=jnp.float32)
                  + bv_ref[...]).astype(v_ref.dtype)


def _kv_proj_kernel(x_ref, wk_ref, bk_ref, wv_ref, bv_ref, k_ref, v_ref):
    y = x_ref[...].astype(jnp.bfloat16)
    k_ref[...] = (jnp.dot(y, wk_ref[...], preferred_element_type=jnp.float32)
                  + bk_ref[...]).astype(k_ref.dtype)
    v_ref[...] = (jnp.dot(y, wv_ref[...], preferred_element_type=jnp.float32)
                  + bv_ref[...]).astype(v_ref.dtype)


def _ln_linear_kernel(x_ref, g_ref, b_ref, w_ref, bias_ref, o_ref):
    y = _layernorm(x_ref[...], g_ref[...], b_ref[...]).astype(jnp.bfloat16)
    o_ref[...] = (jnp.dot(y, w_ref[...], preferred_element_type=jnp.float32)
                  + bias_ref[...]).astype(o_ref.dtype)


def _ln_kernel(x_ref, g_ref, b_ref, o_ref):
    o_ref[...] = _layernorm(x_ref[...], g_ref[...], b_ref[...]).astype(o_ref.dtype)


def _linear_kernel(x_ref, w_ref, bias_ref, o_ref):
    o_ref[...] = (jnp.dot(x_ref[...].astype(jnp.bfloat16), w_ref[...],
                          preferred_element_type=jnp.float32)
                  + bias_ref[...]).astype(o_ref.dtype)


def _linear_res_kernel(x_ref, w_ref, bias_ref, res_ref, o_ref):
    o_ref[...] = (jnp.dot(x_ref[...].astype(jnp.bfloat16), w_ref[...],
                          preferred_element_type=jnp.float32)
                  + bias_ref[...] + res_ref[...]).astype(o_ref.dtype)


def _ln_ffn_kernel(x_ref, g_ref, b_ref, w1_ref, b1_ref, w2_ref, b2_ref, o_ref,
                   y_sc, acc_sc):
    # out = x + GELU(LN(x) @ W1 + b1) @ W2 + b2, with the hidden dim tiled over
    # the ("arbitrary") f grid axis; LN(x) is computed once per row tile.
    f = pl.program_id(1)
    nf = pl.num_programs(1)

    @pl.when(f == 0)
    def _():
        x = x_ref[...]
        y_sc[...] = _layernorm(x, g_ref[...], b_ref[...]).astype(jnp.bfloat16)
        acc_sc[...] = x + b2_ref[...]

    h = jnp.dot(y_sc[...], w1_ref[...],
                preferred_element_type=jnp.float32) + b1_ref[...]
    h = _gelu_exact(h).astype(jnp.bfloat16)
    acc_sc[...] = acc_sc[...] + jnp.dot(h, w2_ref[...],
                                        preferred_element_type=jnp.float32)

    @pl.when(f == nf - 1)
    def _():
        o_ref[...] = acc_sc[...]


def _mha_kernel(q_ref, k_ref, v_ref, o_ref, *, num_heads, dh, scale, causal):
    # One (batch, query-tile) per grid step; all heads computed in-kernel.
    # TODO(synk): pack heads / flash-style KV tiling for long sequences and
    # better MXU fill when dh < 128 (per-head contraction underfills the MXU).
    tq = q_ref.shape[1]
    sk = k_ref.shape[1]
    q = q_ref[0]                                   # (tq, D) bf16
    k = k_ref[0]                                   # (Sk, D) bf16
    v = v_ref[0]                                   # (Sk, D) bf16
    if causal:
        row = (pl.program_id(1) * tq
               + jax.lax.broadcasted_iota(jnp.int32, (tq, sk), 0))
        col = jax.lax.broadcasted_iota(jnp.int32, (tq, sk), 1)
        neg = jnp.where(col > row, jnp.float32(_NEG_INF), jnp.float32(0.0))
    for h in range(num_heads):
        sl = slice(h * dh, (h + 1) * dh)
        qh, kh, vh = q[:, sl], k[:, sl], v[:, sl]
        s = jax.lax.dot_general(qh, kh, (((1,), (1,)), ((), ())),
                                preferred_element_type=jnp.float32) * scale
        if causal:
            s = s + neg
        m = jnp.max(s, axis=-1, keepdims=True)
        p = jnp.exp(s - m)
        l = jnp.sum(p, axis=-1, keepdims=True)
        oh = jnp.dot(p.astype(jnp.bfloat16), vh,
                     preferred_element_type=jnp.float32)
        o_ref[0, :, sl] = (oh * pl.reciprocal(l, approx=True)).astype(o_ref.dtype)


# ----------------------------- wrappers --------------------------------

def embed_lookup(tokens, emb_w, pe, scale):
    """token ids (B, S) -> (B*S, D) f32: in-kernel gather + scale + pos-enc."""
    B, S = tokens.shape
    D = emb_w.shape[1]
    M = B * S
    tr = _pick_tile(S, EMBED_ROWS, 8)
    nps = S // tr
    toks = tokens.reshape(M).astype(jnp.int32)
    pe_s = pe[:S]
    return pl.pallas_call(
        functools.partial(_embed_kernel, scale=scale, tr=tr),
        grid_spec=pltpu.PrefetchScalarGridSpec(
            num_scalar_prefetch=1,
            grid=(M // tr,),
            in_specs=[pl.BlockSpec(memory_space=pl.ANY),            # emb table (HBM)
                      pl.BlockSpec((tr, D), lambda i, tok: (i % nps, 0))],
            out_specs=pl.BlockSpec((tr, D), lambda i, tok: (i, 0)),
            scratch_shapes=[pltpu.VMEM((tr, D), jnp.float32),
                            pltpu.SemaphoreType.DMA((tr,))]),
        out_shape=jax.ShapeDtypeStruct((M, D), jnp.float32),
        compiler_params=_cparams(("parallel",)),
    )(toks, emb_w, pe_s)


def fused_ln_qkv(x2d, g, b, wq, bq, wk, bk, wv, bv):
    """LN(x) + the three Q/K/V projections in one kernel -> bf16 outputs."""
    M, D = x2d.shape
    tr = _pick_tile(M, ROW_TILE, 16)
    w_spec = pl.BlockSpec((D, D), lambda i: (0, 0))
    v_spec = pl.BlockSpec((1, D), lambda i: (0, 0))
    row_spec = pl.BlockSpec((tr, D), lambda i: (i, 0))
    # TODO(synk): single-buffer the constant-index weight blocks
    # (pipeline_mode=pl.Buffered(1)) once buffer_count=1 is accepted; saves
    # half the weight VMEM on v7x.
    return pl.pallas_call(
        _ln_qkv_kernel,
        grid=(M // tr,),
        in_specs=[row_spec, v_spec, v_spec,
                  w_spec, v_spec, w_spec, v_spec, w_spec, v_spec],
        out_specs=[row_spec, row_spec, row_spec],
        out_shape=(jax.ShapeDtypeStruct((M, D), jnp.bfloat16),) * 3,
        compiler_params=_cparams(("parallel",)),
    )(x2d, g.reshape(1, D), b.reshape(1, D),
      wq, bq.reshape(1, D), wk, bk.reshape(1, D), wv, bv.reshape(1, D))


def kv_proj(x2d, wk, bk, wv, bv):
    """Plain K and V projections of the (un-normed) encoder memory -> bf16."""
    M, D = x2d.shape
    tr = _pick_tile(M, ROW_TILE, 16)
    w_spec = pl.BlockSpec((D, D), lambda i: (0, 0))
    v_spec = pl.BlockSpec((1, D), lambda i: (0, 0))
    row_spec = pl.BlockSpec((tr, D), lambda i: (i, 0))
    return pl.pallas_call(
        _kv_proj_kernel,
        grid=(M // tr,),
        in_specs=[row_spec, w_spec, v_spec, w_spec, v_spec],
        out_specs=[row_spec, row_spec],
        out_shape=(jax.ShapeDtypeStruct((M, D), jnp.bfloat16),) * 2,
        compiler_params=_cparams(("parallel",)),
    )(x2d, wk, bk.reshape(1, D), wv, bv.reshape(1, D))


def ln_linear(x2d, g, b, w, bias):
    """LayerNorm fused with a single-tile projection -> bf16 (cross-attn Q)."""
    M, K = x2d.shape
    N = w.shape[1]
    tr = _pick_tile(M, ROW_TILE, 16)
    return pl.pallas_call(
        _ln_linear_kernel,
        grid=(M // tr,),
        in_specs=[pl.BlockSpec((tr, K), lambda i: (i, 0)),
                  pl.BlockSpec((1, K), lambda i: (0, 0)),
                  pl.BlockSpec((1, K), lambda i: (0, 0)),
                  pl.BlockSpec((K, N), lambda i: (0, 0)),
                  pl.BlockSpec((1, N), lambda i: (0, 0))],
        out_specs=pl.BlockSpec((tr, N), lambda i: (i, 0)),
        out_shape=jax.ShapeDtypeStruct((M, N), jnp.bfloat16),
        compiler_params=_cparams(("parallel",)),
    )(x2d, g.reshape(1, K), b.reshape(1, K), w, bias.reshape(1, N))


def ln_only(x2d, g, b):
    """Final LayerNorm, hoisted out of the vocab-tiled projection -> bf16."""
    M, D = x2d.shape
    tr = _pick_tile(M, ROW_TILE, 16)
    return pl.pallas_call(
        _ln_kernel,
        grid=(M // tr,),
        in_specs=[pl.BlockSpec((tr, D), lambda i: (i, 0)),
                  pl.BlockSpec((1, D), lambda i: (0, 0)),
                  pl.BlockSpec((1, D), lambda i: (0, 0))],
        out_specs=pl.BlockSpec((tr, D), lambda i: (i, 0)),
        out_shape=jax.ShapeDtypeStruct((M, D), jnp.bfloat16),
        compiler_params=_cparams(("parallel",)),
    )(x2d, g.reshape(1, D), b.reshape(1, D))


def linear(x2d, w, bias, residual=None, out_dtype=jnp.float32):
    """x @ W + b (+ residual), N-tiled for wide outputs (vocab projection)."""
    M, K = x2d.shape
    N = w.shape[1]
    tr = _pick_tile(M, ROW_TILE, 16)
    tn = _pick_tile(N, COL_TILE, 128)
    common = dict(
        grid=(M // tr, N // tn),
        out_specs=pl.BlockSpec((tr, tn), lambda i, j: (i, j)),
        out_shape=jax.ShapeDtypeStruct((M, N), out_dtype),
        compiler_params=_cparams(("parallel", "parallel")))
    base = [pl.BlockSpec((tr, K), lambda i, j: (i, 0)),
            pl.BlockSpec((K, tn), lambda i, j: (0, j)),
            pl.BlockSpec((1, tn), lambda i, j: (0, j))]
    if residual is None:
        return pl.pallas_call(_linear_kernel, in_specs=base, **common)(
            x2d, w, bias.reshape(1, N))
    return pl.pallas_call(
        _linear_res_kernel,
        in_specs=base + [pl.BlockSpec((tr, tn), lambda i, j: (i, j))],
        **common,
    )(x2d, w, bias.reshape(1, N), residual)


def ln_ffn(x2d, g, b, w1, b1, w2, b2):
    """Pre-LN FFN block (LN + W1 + GELU + W2 + residual) with d_ff tiling."""
    M, D = x2d.shape
    F = w1.shape[1]
    tr = _pick_tile(M, ROW_TILE, 16)
    tf = _pick_tile(F, 1024, 128)
    return pl.pallas_call(
        _ln_ffn_kernel,
        grid=(M // tr, F // tf),
        in_specs=[pl.BlockSpec((tr, D), lambda i, f: (i, 0)),
                  pl.BlockSpec((1, D), lambda i, f: (0, 0)),
                  pl.BlockSpec((1, D), lambda i, f: (0, 0)),
                  pl.BlockSpec((D, tf), lambda i, f: (0, f)),
                  pl.BlockSpec((1, tf), lambda i, f: (0, f)),
                  pl.BlockSpec((tf, D), lambda i, f: (f, 0)),
                  pl.BlockSpec((1, D), lambda i, f: (0, 0))],
        out_specs=pl.BlockSpec((tr, D), lambda i, f: (i, 0)),
        out_shape=jax.ShapeDtypeStruct((M, D), jnp.float32),
        scratch_shapes=[pltpu.VMEM((tr, D), jnp.bfloat16),   # cached LN(x)
                        pltpu.VMEM((tr, D), jnp.float32)],   # accumulator
        compiler_params=_cparams(("parallel", "arbitrary")),
    )(x2d, g.reshape(1, D), b.reshape(1, D), w1, b1.reshape(1, F),
      w2, b2.reshape(1, D))


def mha(q, k, v, B, Sq, Sk, num_heads, causal):
    """q: (B*Sq, D), k/v: (B*Sk, D) bf16 -> (B*Sq, D) bf16."""
    D = q.shape[1]
    dh = D // num_heads
    tq = _pick_tile(Sq, ROW_TILE, 16)
    q3 = q.reshape(B, Sq, D)
    k3 = k.reshape(B, Sk, D)
    v3 = v.reshape(B, Sk, D)
    out = pl.pallas_call(
        functools.partial(_mha_kernel, num_heads=num_heads, dh=dh,
                          scale=1.0 / math.sqrt(dh), causal=causal),
        grid=(B, Sq // tq),
        in_specs=[pl.BlockSpec((1, tq, D), lambda b, i: (b, i, 0)),
                  pl.BlockSpec((1, Sk, D), lambda b, i: (b, 0, 0)),
                  pl.BlockSpec((1, Sk, D), lambda b, i: (b, 0, 0))],
        out_specs=pl.BlockSpec((1, tq, D), lambda b, i: (b, i, 0)),
        out_shape=jax.ShapeDtypeStruct((B, Sq, D), jnp.bfloat16),
        compiler_params=_cparams(("parallel", "parallel")),
    )(q3, k3, v3)
    return out.reshape(B * Sq, D)


# ----------------------- model (pre-LN enc/dec) ------------------------

def encoder_layer(x, p, num_heads, B, S):
    q, k, v = fused_ln_qkv(x, p["ln1_g"], p["ln1_b"],
                           p["sa"]["wq"], p["sa"]["bq"],
                           p["sa"]["wk"], p["sa"]["bk"],
                           p["sa"]["wv"], p["sa"]["bv"])
    attn = mha(q, k, v, B, S, S, num_heads, causal=False)
    x = linear(attn, p["sa"]["wo"], p["sa"]["bo"], residual=x)
    x = ln_ffn(x, p["ln2_g"], p["ln2_b"],
               p["ffn"]["w1"], p["ffn"]["b1"], p["ffn"]["w2"], p["ffn"]["b2"])
    return x


def decoder_layer(x, mem, p, num_heads, B, St, Ss):
    # masked self-attention (causal mask generated in-kernel)
    q, k, v = fused_ln_qkv(x, p["ln1_g"], p["ln1_b"],
                           p["sa"]["wq"], p["sa"]["bq"],
                           p["sa"]["wk"], p["sa"]["bk"],
                           p["sa"]["wv"], p["sa"]["bv"])
    attn = mha(q, k, v, B, St, St, num_heads, causal=True)
    x = linear(attn, p["sa"]["wo"], p["sa"]["bo"], residual=x)
    # cross-attention (memory is NOT normalized, matching norm_first PyTorch)
    qc = ln_linear(x, p["ln2_g"], p["ln2_b"], p["ca"]["wq"], p["ca"]["bq"])
    kc, vc = kv_proj(mem, p["ca"]["wk"], p["ca"]["bk"],
                     p["ca"]["wv"], p["ca"]["bv"])
    attn = mha(qc, kc, vc, B, St, Ss, num_heads, causal=False)
    x = linear(attn, p["ca"]["wo"], p["ca"]["bo"], residual=x)
    # feed-forward
    x = ln_ffn(x, p["ln3_g"], p["ln3_b"],
               p["ffn"]["w1"], p["ffn"]["b1"], p["ffn"]["w2"], p["ffn"]["b2"])
    return x


def transformer_forward(params, src, tgt):
    """forward(src, tgt): encode then decode -> logits (B, tgt_len, vocab)."""
    cfg = params["cfg"]
    D, H, V = cfg["d_model"], cfg["num_heads"], cfg["vocab"]
    B, Ss = src.shape
    _, St = tgt.shape
    scale = math.sqrt(D)

    # ---- encode ----
    mem = embed_lookup(src, params["emb"], params["pe"], scale)     # (B*Ss, D)
    for lp in params["enc"]:
        mem = encoder_layer(mem, lp, H, B, Ss)

    # ---- decode ----
    x = embed_lookup(tgt, params["emb"], params["pe"], scale)       # (B*St, D)
    for lp in params["dec"]:
        x = decoder_layer(x, mem, lp, H, B, St, Ss)

    # ---- output norm (once) + vocab projection (N-tiled) ----
    y = ln_only(x, params["out_norm_g"], params["out_norm_b"])
    logits = linear(y, params["out_w"], params["out_b"])
    return logits.reshape(B, St, V)


# ----------------------------- init ------------------------------------

def sinusoidal_pos_encoding(max_len, d_model):
    max_len = max(max_len, 2048)
    position = jnp.arange(max_len, dtype=jnp.float32)[:, None]
    div_term = jnp.exp(jnp.arange(0, d_model, 2, dtype=jnp.float32)
                       * (-math.log(10000.0) / d_model))
    pe = jnp.zeros((max_len, d_model), jnp.float32)
    pe = pe.at[:, 0::2].set(jnp.sin(position * div_term))
    pe = pe.at[:, 1::2].set(jnp.cos(position * div_term[: d_model // 2]))
    return pe


def init_params(key, vocab, d_model, num_heads, num_layers, d_ff,
                max_seq_length=512):
    kit = iter(jax.random.split(key, 8 + num_layers * 48))

    def xavier(fan_in, fan_out, gain=0.02):
        std = gain * math.sqrt(2.0 / (fan_in + fan_out))
        return jax.random.normal(next(kit), (fan_in, fan_out), jnp.float32) * std

    def zeros(n):
        return jnp.zeros((n,), jnp.float32)

    def attn():
        return {"wq": xavier(d_model, d_model).astype(jnp.bfloat16), "bq": zeros(d_model),
                "wk": xavier(d_model, d_model).astype(jnp.bfloat16), "bk": zeros(d_model),
                "wv": xavier(d_model, d_model).astype(jnp.bfloat16), "bv": zeros(d_model),
                "wo": xavier(d_model, d_model).astype(jnp.bfloat16), "bo": zeros(d_model)}

    def ffn():
        return {"w1": xavier(d_model, d_ff).astype(jnp.bfloat16), "b1": zeros(d_ff),
                "w2": xavier(d_ff, d_model).astype(jnp.bfloat16), "b2": zeros(d_model)}

    def ln():
        return jnp.ones((d_model,), jnp.float32), jnp.zeros((d_model,), jnp.float32)

    enc = []
    for _ in range(num_layers):
        g1, b1 = ln(); g2, b2 = ln()
        enc.append({"ln1_g": g1, "ln1_b": b1, "sa": attn(),
                    "ln2_g": g2, "ln2_b": b2, "ffn": ffn()})
    dec = []
    for _ in range(num_layers):
        g1, b1 = ln(); g2, b2 = ln(); g3, b3 = ln()
        dec.append({"ln1_g": g1, "ln1_b": b1, "sa": attn(),
                    "ln2_g": g2, "ln2_b": b2, "ca": attn(),
                    "ln3_g": g3, "ln3_b": b3, "ffn": ffn()})

    og, ob = ln()
    return {
        "cfg": {"d_model": d_model, "num_heads": num_heads, "vocab": vocab},
        "emb": jax.random.normal(next(kit), (vocab, d_model), jnp.float32) * 0.02,
        "pe": sinusoidal_pos_encoding(max_seq_length, d_model),
        "enc": enc, "dec": dec,
        "out_norm_g": og, "out_norm_b": ob,
        "out_w": xavier(d_model, vocab).astype(jnp.bfloat16),
        "out_b": zeros(vocab),
    }


# ----------------------------- demo ------------------------------------

if __name__ == "__main__":
    VOCAB, D_MODEL, NUM_HEADS, NUM_LAYERS, D_FF = 64, 32, 4, 2, 64
    B, S_SRC, S_TGT = 2, 16, 8

    key = jax.random.PRNGKey(0)
    k_params, k_src, k_tgt = jax.random.split(key, 3)
    params = init_params(k_params, VOCAB, D_MODEL, NUM_HEADS, NUM_LAYERS, D_FF)
    src = jax.random.randint(k_src, (B, S_SRC), 0, VOCAB, dtype=jnp.int32)
    tgt = jax.random.randint(k_tgt, (B, S_TGT), 0, VOCAB, dtype=jnp.int32)

    logits = transformer_forward(params, src, tgt)
    logits = jax.block_until_ready(logits)

    assert logits.shape == (B, S_TGT, VOCAB), logits.shape
    assert bool(jnp.all(jnp.isfinite(logits)))
    print("KERNEL_OK")
</pallas_src>

<mosaic_0001>
module attributes {stable_mosaic.version = 11 : i64} {
  func.func @_embed_kernel(%arg0: i32, %arg1: memref<32xi32, #tpu.memory_space<smem>>, %arg2: memref<64x32xf32, #tpu.memory_space<any>>, %arg3: memref<16x32xf32, #tpu.memory_space<vmem>>, %arg4: memref<16x32xf32, #tpu.memory_space<vmem>>, %arg5: memref<16x32xf32, #tpu.memory_space<vmem>>, %arg6: memref<16x!tpu.dma_semaphore, #tpu.memory_space<semaphore_mem>>) attributes {dimension_semantics = [#tpu.dimension_semantics<parallel>], iteration_bounds = array<i64: 2>, scalar_prefetch = 1 : i64, scratch_operands = 2 : i64, tpu.core_type = #tpu.core_type<tc>, window_params = [{}, {transform_indices = @transform_1, window_bounds = array<i64: 16, 32>}, {transform_indices = @transform_2, window_bounds = array<i64: 16, 32>}]} {
    %c16_i32 = arith.constant 16 : i32
    %0 = arith.muli %arg0, %c16_i32 : i32
    %c0_i32 = arith.constant 0 : i32
    %1 = arith.addi %0, %c0_i32 : i32
    %2 = arith.index_cast %1 : i32 to index
    %3 = memref.load %arg1[%2] : memref<32xi32, #tpu.memory_space<smem>>
    %c0_i32_0 = arith.constant 0 : i32
    %c0_i32_1 = arith.constant 0 : i32
    %c0_i32_2 = arith.constant 0 : i32
    %4 = tpu.memref_slice %arg2[%3, %c0_i32_2] : memref<64x32xf32, #tpu.memory_space<any>> -> memref<1x32xf32, #tpu.memory_space<any>>
    %5 = tpu.memref_squeeze %4 : memref<1x32xf32, #tpu.memory_space<any>> -> memref<32xf32, #tpu.memory_space<any>>
    %c0_i32_3 = arith.constant 0 : i32
    %6 = tpu.memref_slice %arg5[%c0_i32_0, %c0_i32_3] : memref<16x32xf32, #tpu.memory_space<vmem>> -> memref<1x32xf32, #tpu.memory_space<vmem>>
    %7 = tpu.memref_squeeze %6 : memref<1x32xf32, #tpu.memory_space<vmem>> -> memref<32xf32, #tpu.memory_space<vmem>>
    %8 = tpu.memref_slice %arg6[%c0_i32_1] : memref<16x!tpu.dma_semaphore, #tpu.memory_space<semaphore_mem>> -> memref<1x!tpu.dma_semaphore, #tpu.memory_space<semaphore_mem>>
    %9 = tpu.memref_squeeze %8 : memref<1x!tpu.dma_semaphore, #tpu.memory_space<semaphore_mem>> -> memref<!tpu.dma_semaphore, #tpu.memory_space<semaphore_mem>>
    tpu.enqueue_dma source(%5 : memref<32xf32, #tpu.memory_space<any>>) target(%7 : memref<32xf32, #tpu.memory_space<vmem>>) target_semaphore(%9 : memref<!tpu.dma_semaphore, #tpu.memory_space<semaphore_mem>>)
    %c1_i32 = arith.constant 1 : i32
    %10 = arith.addi %0, %c1_i32 : i32
    %11 = arith.index_cast %10 : i32 to index
    %12 = memref.load %arg1[%11] : memref<32xi32, #tpu.memory_space<smem>>
    %c1_i32_4 = arith.constant 1 : i32
    %c1_i32_5 = arith.constant 1 : i32
    %c0_i32_6 = arith.constant 0 : i32
    %13 = tpu.memref_slice %arg2[%12, %c0_i32_6] : memref<64x32xf32, #tpu.memory_space<any>> -> memref<1x32xf32, #tpu.memory_space<any>>
    %14 = tpu.memref_squeeze %13 : memref<1x32xf32, #tpu.memory_space<any>> -> memref<32xf32, #tpu.memory_space<any>>
    %c0_i32_7 = arith.constant 0 : i32
    %15 = tpu.memref_slice %arg5[%c1_i32_4, %c0_i32_7] : memref<16x32xf32, #tpu.memory_space<vmem>> -> memref<1x32xf32, #tpu.memory_space<vmem>>
    %16 = tpu.memref_squeeze %15 : memref<1x32xf32, #tpu.memory_space<vmem>> -> memref<32xf32, #tpu.memory_space<vmem>>
    %17 = tpu.memref_slice %arg6[%c1_i32_5] : memref<16x!tpu.dma_semaphore, #tpu.memory_space<semaphore_mem>> -> memref<1x!tpu.dma_semaphore, #tpu.memory_space<semaphore_mem>>
    %18 = tpu.memref_squeeze %17 : memref<1x!tpu.dma_semaphore, #tpu.memory_space<semaphore_mem>> -> memref<!tpu.dma_semaphore, #tpu.memory_space<semaphore_mem>>
    tpu.enqueue_dma source(%14 : memref<32xf32, #tpu.memory_space<any>>) target(%16 : memref<32xf32, #tpu.memory_space<vmem>>) target_semaphore(%18 : memref<!tpu.dma_semaphore, #tpu.memory_space<semaphore_mem>>)
    %c2_i32 = arith.constant 2 : i32
    %19 = arith.addi %0, %c2_i32 : i32
    %20 = arith.index_cast %19 : i32 to index
    %21 = memref.load %arg1[%20] : memref<32xi32, #tpu.memory_space<smem>>
    %c2_i32_8 = arith.constant 2 : i32
    %c2_i32_9 = arith.constant 2 : i32
    %c0_i32_10 = arith.constant 0 : i32
    %22 = tpu.memref_slice %arg2[%21, %c0_i32_10] : memref<64x32xf32, #tpu.memory_space<any>> -> memref<1x32xf32, #tpu.memory_space<any>>
    %23 = tpu.memref_squeeze %22 : memref<1x32xf32, #tpu.memory_space<any>> -> memref<32xf32, #tpu.memory_space<any>>
    %c0_i32_11 = arith.constant 0 : i32
    %24 = tpu.memref_slice %arg5[%c2_i32_8, %c0_i32_11] : memref<16x32xf32, #tpu.memory_space<vmem>> -> memref<1x32xf32, #tpu.memory_space<vmem>>
    %25 = tpu.memref_squeeze %24 : memref<1x32xf32, #tpu.memory_space<vmem>> -> memref<32xf32, #tpu.memory_space<vmem>>
    %26 = tpu.memref_slice %arg6[%c2_i32_9] : memref<16x!tpu.dma_semaphore, #tpu.memory_space<semaphore_mem>> -> memref<1x!tpu.dma_semaphore, #tpu.memory_space<semaphore_mem>>
    %27 = tpu.memref_squeeze %26 : memref<1x!tpu.dma_semaphore, #tpu.memory_space<semaphore_mem>> -> memref<!tpu.dma_semaphore, #tpu.memory_space<semaphore_mem>>
    tpu.enqueue_dma source(%23 : memref<32xf32, #tpu.memory_space<any>>) target(%25 : memref<32xf32, #tpu.memory_space<vmem>>) target_semaphore(%27 : memref<!tpu.dma_semaphore, #tpu.memory_space<semaphore_mem>>)
    %c3_i32 = arith.constant 3 : i32
    %28 = arith.addi %0, %c3_i32 : i32
    %29 = arith.index_cast %28 : i32 to index
    %30 = memref.load %arg1[%29] : memref<32xi32, #tpu.memory_space<smem>>
    %c3_i32_12 = arith.constant 3 : i32
    %c3_i32_13 = arith.constant 3 : i32
    %c0_i32_14 = arith.constant 0 : i32
    %31 = tpu.memref_slice %arg2[%30, %c0_i32_14] : memref<64x32xf32, #tpu.memory_space<any>> -> memref<1x32xf32, #tpu.memory_space<any>>
    %32 = tpu.memref_squeeze %31 : memref<1x32xf32, #tpu.memory_space<any>> -> memref<32xf32, #tpu.memory_space<any>>
    %c0_i32_15 = arith.constant 0 : i32
    %33 = tpu.memref_slice %arg5[%c3_i32_12, %c0_i32_15] : memref<16x32xf32, #tpu.memory_space<vmem>> -> memref<1x32xf32, #tpu.memory_space<vmem>>
    %34 = tpu.memref_squeeze %33 : memref<1x32xf32, #tpu.memory_space<vmem>> -> memref<32xf32, #tpu.memory_space<vmem>>
    %35 = tpu.memref_slice %arg6[%c3_i32_13] : memref<16x!tpu.dma_semaphore, #tpu.memory_space<semaphore_mem>> -> memref<1x!tpu.dma_semaphore, #tpu.memory_space<semaphore_mem>>
    %36 = tpu.memref_squeeze %35 : memref<1x!tpu.dma_semaphore, #tpu.memory_space<semaphore_mem>> -> memref<!tpu.dma_semaphore, #tpu.memory_space<semaphore_mem>>
    tpu.enqueue_dma source(%32 : memref<32xf32, #tpu.memory_space<any>>) target(%34 : memref<32xf32, #tpu.memory_space<vmem>>) target_semaphore(%36 : memref<!tpu.dma_semaphore, #tpu.memory_space<semaphore_mem>>)
    %c4_i32 = arith.constant 4 : i32
    %37 = arith.addi %0, %c4_i32 : i32
    %38 = arith.index_cast %37 : i32 to index
    %39 = memref.load %arg1[%38] : memref<32xi32, #tpu.memory_space<smem>>
    %c4_i32_16 = arith.constant 4 : i32
    %c4_i32_17 = arith.constant 4 : i32
    %c0_i32_18 = arith.constant 0 : i32
    %40 = tpu.memref_slice %arg2[%39, %c0_i32_18] : memref<64x32xf32, #tpu.memory_space<any>> -> memref<1x32xf32, #tpu.memory_space<any>>
    %41 = tpu.memref_squeeze %40 : memref<1x32xf32, #tpu.memory_space<any>> -> memref<32xf32, #tpu.memory_space<any>>
    %c0_i32_19 = arith.constant 0 : i32
    %42 = tpu.memref_slice %arg5[%c4_i32_16, %c0_i32_19] : memref<16x32xf32, #tpu.memory_space<vmem>> -> memref<1x32xf32, #tpu.memory_space<vmem>>
    %43 = tpu.memref_squeeze %42 : memref<1x32xf32, #tpu.memory_space<vmem>> -> memref<32xf32, #tpu.memory_space<vmem>>
    %44 = tpu.memref_slice %arg6[%c4_i32_17] : memref<16x!tpu.dma_semaphore, #tpu.memory_space<semaphore_mem>> -> memref<1x!tpu.dma_semaphore, #tpu.memory_space<semaphore_mem>>
    %45 = tpu.memref_squeeze %44 : memref<1x!tpu.dma_semaphore, #tpu.memory_space<semaphore_mem>> -> memref<!tpu.dma_semaphore, #tpu.memory_space<semaphore_mem>>
    tpu.enqueue_dma source(%41 : memref<32xf32, #tpu.memory_space<any>>) target(%43 : memref<32xf32, #tpu.memory_space<vmem>>) target_semaphore(%45 : memref<!tpu.dma_semaphore, #tpu.memory_space<semaphore_mem>>)
    %c5_i32 = arith.constant 5 : i32
    %46 = arith.addi %0, %c5_i32 : i32
    %47 = arith.index_cast %46 : i32 to index
    %48 = memref.load %arg1[%47] : memref<32xi32, #tpu.memory_space<smem>>
    %c5_i32_20 = arith.constant 5 : i32
    %c5_i32_21 = arith.constant 5 : i32
    %c0_i32_22 = arith.constant 0 : i32
    %49 = tpu.memref_slice %arg2[%48, %c0_i32_22] : memref<64x32xf32, #tpu.memory_space<any>> -> memref<1x32xf32, #tpu.memory_space<any>>
    %50 = tpu.memref_squeeze %49 : memref<1x32xf32, #tpu.memory_space<any>> -> memref<32xf32, #tpu.memory_space<any>>
    %c0_i32_23 = arith.constant 0 : i32
    %51 = tpu.memref_slice %arg5[%c5_i32_20, %c0_i32_23] : memref<16x32xf32, #tpu.memory_space<vmem>> -> memref<1x32xf32, #tpu.memory_space<vmem>>
    %52 = tpu.memref_squeeze %51 : memref<1x32xf32, #tpu.memory_space<vmem>> -> memref<32xf32, #tpu.memory_space<vmem>>
    %53 = tpu.memref_slice %arg6[%c5_i32_21] : memref<16x!tpu.dma_semaphore, #tpu.memory_space<semaphore_mem>> -> memref<1x!tpu.dma_semaphore, #tpu.memory_space<semaphore_mem>>
    %54 = tpu.memref_squeeze %53 : memref<1x!tpu.dma_semaphore, #tpu.memory_space<semaphore_mem>> -> memref<!tpu.dma_semaphore, #tpu.memory_space<semaphore_mem>>
    tpu.enqueue_dma source(%50 : memref<32xf32, #tpu.memory_space<any>>) target(%52 : memref<32xf32, #tpu.memory_space<vmem>>) target_semaphore(%54 : memref<!tpu.dma_semaphore, #tpu.memory_space<semaphore_mem>>)
    %c6_i32 = arith.constant 6 : i32
    %55 = arith.addi %0, %c6_i32 : i32
    %56 = arith.index_cast %55 : i32 to index
    %57 = memref.load %arg1[%56] : memref<32xi32, #tpu.memory_space<smem>>
    %c6_i32_24 = arith.constant 6 : i32
    %c6_i32_25 = arith.constant 6 : i32
    %c0_i32_26 = arith.constant 0 : i32
    %58 = tpu.memref_slice %arg2[%57, %c0_i32_26] : memref<64x32xf32, #tpu.memory_space<any>> -> memref<1x32xf32, #tpu.memory_space<any>>
    %59 = tpu.memref_squeeze %58 : memref<1x32xf32, #tpu.memory_space<any>> -> memref<32xf32, #tpu.memory_space<any>>
    %c0_i32_27 = arith.constant 0 : i32
    %60 = tpu.memref_slice %arg5[%c6_i32_24, %c0_i32_27] : memref<16x32xf32, #tpu.memory_space<vmem>> -> memref<1x32xf32, #tpu.memory_space<vmem>>
    %61 = tpu.memref_squeeze %60 : memref<1x32xf32, #tpu.memory_space<vmem>> -> memref<32xf32, #tpu.memory_space<vmem>>
    %62 = tpu.memref_slice %arg6[%c6_i32_25] : memref<16x!tpu.dma_semaphore, #tpu.memory_space<semaphore_mem>> -> memref<1x!tpu.dma_semaphore, #tpu.memory_space<semaphore_mem>>
    %63 = tpu.memref_squeeze %62 : memref<1x!tpu.dma_semaphore, #tpu.memory_space<semaphore_mem>> -> memref<!tpu.dma_semaphore, #tpu.memory_space<semaphore_mem>>
    tpu.enqueue_dma source(%59 : memref<32xf32, #tpu.memory_space<any>>) target(%61 : memref<32xf32, #tpu.memory_space<vmem>>) target_semaphore(%63 : memref<!tpu.dma_semaphore, #tpu.memory_space<semaphore_mem>>)
    %c7_i32 = arith.constant 7 : i32
    %64 = arith.addi %0, %c7_i32 : i32
    %65 = arith.index_cast %64 : i32 to index
    %66 = memref.load %arg1[%65] : memref<32xi32, #tpu.memory_space<smem>>
    %c7_i32_28 = arith.constant 7 : i32
    %c7_i32_29 = arith.constant 7 : i32
    %c0_i32_30 = arith.constant 0 : i32
    %67 = tpu.memref_slice %arg2[%66, %c0_i32_30] : memref<64x32xf32, #tpu.memory_space<any>> -> memref<1x32xf32, #tpu.memory_space<any>>
    %68 = tpu.memref_squeeze %67 : memref<1x32xf32, #tpu.memory_space<any>> -> memref<32xf32, #tpu.memory_space<any>>
    %c0_i32_31 = arith.constant 0 : i32
    %69 = tpu.memref_slice %arg5[%c7_i32_28, %c0_i32_31] : memref<16x32xf32, #tpu.memory_space<vmem>> -> memref<1x32xf32, #tpu.memory_space<vmem>>
    %70 = tpu.memref_squeeze %69 : memref<1x32xf32, #tpu.memory_space<vmem>> -> memref<32xf32, #tpu.memory_space<vmem>>
    %71 = tpu.memref_slice %arg6[%c7_i32_29] : memref<16x!tpu.dma_semaphore, #tpu.memory_space<semaphore_mem>> -> memref<1x!tpu.dma_semaphore, #tpu.memory_space<semaphore_mem>>
    %72 = tpu.memref_squeeze %71 : memref<1x!tpu.dma_semaphore, #tpu.memory_space<semaphore_mem>> -> memref<!tpu.dma_semaphore, #tpu.memory_space<semaphore_mem>>
    tpu.enqueue_dma source(%68 : memref<32xf32, #tpu.memory_space<any>>) target(%70 : memref<32xf32, #tpu.memory_space<vmem>>) target_semaphore(%72 : memref<!tpu.dma_semaphore, #tpu.memory_space<semaphore_mem>>)
    %c8_i32 = arith.constant 8 : i32
    %73 = arith.addi %0, %c8_i32 : i32
    %74 = arith.index_cast %73 : i32 to index
    %75 = memref.load %arg1[%74] : memref<32xi32, #tpu.memory_space<smem>>
    %c8_i32_32 = arith.constant 8 : i32
    %c8_i32_33 = arith.constant 8 : i32
    %c0_i32_34 = arith.constant 0 : i32
    %76 = tpu.memref_slice %arg2[%75, %c0_i32_34] : memref<64x32xf32, #tpu.memory_space<any>> -> memref<1x32xf32, #tpu.memory_space<any>>
    %77 = tpu.memref_squeeze %76 : memref<1x32xf32, #tpu.memory_space<any>> -> memref<32xf32, #tpu.memory_space<any>>
    %c0_i32_35 = arith.constant 0 : i32
    %78 = tpu.memref_slice %arg5[%c8_i32_32, %c0_i32_35] : memref<16x32xf32, #tpu.memory_space<vmem>> -> memref<1x32xf32, #tpu.memory_space<vmem>>
    %79 = tpu.memref_squeeze %78 : memref<1x32xf32, #tpu.memory_space<vmem>> -> memref<32xf32, #tpu.memory_space<vmem>>
    %80 = tpu.memref_slice %arg6[%c8_i32_33] : memref<16x!tpu.dma_semaphore, #tpu.memory_space<semaphore_mem>> -> memref<1x!tpu.dma_semaphore, #tpu.memory_space<semaphore_mem>>
    %81 = tpu.memref_squeeze %80 : memref<1x!tpu.dma_semaphore, #tpu.memory_space<semaphore_mem>> -> memref<!tpu.dma_semaphore, #tpu.memory_space<semaphore_mem>>
    tpu.enqueue_dma source(%77 : memref<32xf32, #tpu.memory_space<any>>) target(%79 : memref<32xf32, #tpu.memory_space<vmem>>) target_semaphore(%81 : memref<!tpu.dma_semaphore, #tpu.memory_space<semaphore_mem>>)
    %c9_i32 = arith.constant 9 : i32
    %82 = arith.addi %0, %c9_i32 : i32
    %83 = arith.index_cast %82 : i32 to index
    %84 = memref.load %arg1[%83] : memref<32xi32, #tpu.memory_space<smem>>
    %c9_i32_36 = arith.constant 9 : i32
    %c9_i32_37 = arith.constant 9 : i32
    %c0_i32_38 = arith.constant 0 : i32
    %85 = tpu.memref_slice %arg2[%84, %c0_i32_38] : memref<64x32xf32, #tpu.memory_space<any>> -> memref<1x32xf32, #tpu.memory_space<any>>
    %86 = tpu.memref_squeeze %85 : memref<1x32xf32, #tpu.memory_space<any>> -> memref<32xf32, #tpu.memory_space<any>>
    %c0_i32_39 = arith.constant 0 : i32
    %87 = tpu.memref_slice %arg5[%c9_i32_36, %c0_i32_39] : memref<16x32xf32, #tpu.memory_space<vmem>> -> memref<1x32xf32, #tpu.memory_space<vmem>>
    %88 = tpu.memref_squeeze %87 : memref<1x32xf32, #tpu.memory_space<vmem>> -> memref<32xf32, #tpu.memory_space<vmem>>
    %89 = tpu.memref_slice %arg6[%c9_i32_37] : memref<16x!tpu.dma_semaphore, #tpu.memory_space<semaphore_mem>> -> memref<1x!tpu.dma_semaphore, #tpu.memory_space<semaphore_mem>>
    %90 = tpu.memref_squeeze %89 : memref<1x!tpu.dma_semaphore, #tpu.memory_space<semaphore_mem>> -> memref<!tpu.dma_semaphore, #tpu.memory_space<semaphore_mem>>
    tpu.enqueue_dma source(%86 : memref<32xf32, #tpu.memory_space<any>>) target(%88 : memref<32xf32, #tpu.memory_space<vmem>>) target_semaphore(%90 : memref<!tpu.dma_semaphore, #tpu.memory_space<semaphore_mem>>)
    %c10_i32 = arith.constant 10 : i32
    %91 = arith.addi %0, %c10_i32 : i32
    %92 = arith.index_cast %91 : i32 to index
    %93 = memref.load %arg1[%92] : memref<32xi32, #tpu.memory_space<smem>>
    %c10_i32_40 = arith.constant 10 : i32
    %c10_i32_41 = arith.constant 10 : i32
    %c0_i32_42 = arith.constant 0 : i32
    %94 = tpu.memref_slice %arg2[%93, %c0_i32_42] : memref<64x32xf32, #tpu.memory_space<any>> -> memref<1x32xf32, #tpu.memory_space<any>>
    %95 = tpu.memref_squeeze %94 : memref<1x32xf32, #tpu.memory_space<any>> -> memref<32xf32, #tpu.memory_space<any>>
    %c0_i32_43 = arith.constant 0 : i32
    %96 = tpu.memref_slice %arg5[%c10_i32_40, %c0_i32_43] : memref<16x32xf32, #tpu.memory_space<vmem>> -> memref<1x32xf32, #tpu.memory_space<vmem>>
    %97 = tpu.memref_squeeze %96 : memref<1x32xf32, #tpu.memory_space<vmem>> -> memref<32xf32, #tpu.memory_space<vmem>>
    %98 = tpu.memref_slice %arg6[%c10_i32_41] : memref<16x!tpu.dma_semaphore, #tpu.memory_space<semaphore_mem>> -> memref<1x!tpu.dma_semaphore, #tpu.memory_space<semaphore_mem>>
    %99 = tpu.memref_squeeze %98 : memref<1x!tpu.dma_semaphore, #tpu.memory_space<semaphore_mem>> -> memref<!tpu.dma_semaphore, #tpu.memory_space<semaphore_mem>>
    tpu.enqueue_dma source(%95 : memref<32xf32, #tpu.memory_space<any>>) target(%97 : memref<32xf32, #tpu.memory_space<vmem>>) target_semaphore(%99 : memref<!tpu.dma_semaphore, #tpu.memory_space<semaphore_mem>>)
    %c11_i32 = arith.constant 11 : i32
    %100 = arith.addi %0, %c11_i32 : i32
    %101 = arith.index_cast %100 : i32 to index
    %102 = memref.load %arg1[%101] : memref<32xi32, #tpu.memory_space<smem>>
    %c11_i32_44 = arith.constant 11 : i32
    %c11_i32_45 = arith.constant 11 : i32
    %c0_i32_46 = arith.constant 0 : i32
    %103 = tpu.memref_slice %arg2[%102, %c0_i32_46] : memref<64x32xf32, #tpu.memory_space<any>> -> memref<1x32xf32, #tpu.memory_space<any>>
    %104 = tpu.memref_squeeze %103 : memref<1x32xf32, #tpu.memory_space<any>> -> memref<32xf32, #tpu.memory_space<any>>
    %c0_i32_47 = arith.constant 0 : i32
    %105 = tpu.memref_slice %arg5[%c11_i32_44, %c0_i32_47] : memref<16x32xf32, #tpu.memory_space<vmem>> -> memref<1x32xf32, #tpu.memory_space<vmem>>
    %106 = tpu.memref_squeeze %105 : memref<1x32xf32, #tpu.memory_space<vmem>> -> memref<32xf32, #tpu.memory_space<vmem>>
    %107 = tpu.memref_slice %arg6[%c11_i32_45] : memref<16x!tpu.dma_semaphore, #tpu.memory_space<semaphore_mem>> -> memref<1x!tpu.dma_semaphore, #tpu.memory_space<semaphore_mem>>
    %108 = tpu.memref_squeeze %107 : memref<1x!tpu.dma_semaphore, #tpu.memory_space<semaphore_mem>> -> memref<!tpu.dma_semaphore, #tpu.memory_space<semaphore_mem>>
    tpu.enqueue_dma source(%104 : memref<32xf32, #tpu.memory_space<any>>) target(%106 : memref<32xf32, #tpu.memory_space<vmem>>) target_semaphore(%108 : memref<!tpu.dma_semaphore, #tpu.memory_space<semaphore_mem>>)
    %c12_i32 = arith.constant 12 : i32
    %109 = arith.addi %0, %c12_i32 : i32
    %110 = arith.index_cast %109 : i32 to index
    %111 = memref.load %arg1[%110] : memref<32xi32, #tpu.memory_space<smem>>
    %c12_i32_48 = arith.constant 12 : i32
    %c12_i32_49 = arith.constant 12 : i32
    %c0_i32_50 = arith.constant 0 : i32
    %112 = tpu.memref_slice %arg2[%111, %c0_i32_50] : memref<64x32xf32, #tpu.memory_space<any>> -> memref<1x32xf32, #tpu.memory_space<any>>
    %113 = tpu.memref_squeeze %112 : memref<1x32xf32, #tpu.memory_space<any>> -> memref<32xf32, #tpu.memory_space<any>>
    %c0_i32_51 = arith.constant 0 : i32
    %114 = tpu.memref_slice %arg5[%c12_i32_48, %c0_i32_51] : memref<16x32xf32, #tpu.memory_space<vmem>> -> memref<1x32xf32, #tpu.memory_space<vmem>>
    %115 = tpu.memref_squeeze %114 : memref<1x32xf32, #tpu.memory_space<vmem>> -> memref<32xf32, #tpu.memory_space<vmem>>
    %116 = tpu.memref_slice %arg6[%c12_i32_49] : memref<16x!tpu.dma_semaphore, #tpu.memory_space<semaphore_mem>> -> memref<1x!tpu.dma_semaphore, #tpu.memory_space<semaphore_mem>>
    %117 = tpu.memref_squeeze %116 : memref<1x!tpu.dma_semaphore, #tpu.memory_space<semaphore_mem>> -> memref<!tpu.dma_semaphore, #tpu.memory_space<semaphore_mem>>
    tpu.enqueue_dma source(%113 : memref<32xf32, #tpu.memory_space<any>>) target(%115 : memref<32xf32, #tpu.memory_space<vmem>>) target_semaphore(%117 : memref<!tpu.dma_semaphore, #tpu.memory_space<semaphore_mem>>)
    %c13_i32 = arith.constant 13 : i32
    %118 = arith.addi %0, %c13_i32 : i32
    %119 = arith.index_cast %118 : i32 to index
    %120 = memref.load %arg1[%119] : memref<32xi32, #tpu.memory_space<smem>>
    %c13_i32_52 = arith.constant 13 : i32
    %c13_i32_53 = arith.constant 13 : i32
    %c0_i32_54 = arith.constant 0 : i32
    %121 = tpu.memref_slice %arg2[%120, %c0_i32_54] : memref<64x32xf32, #tpu.memory_space<any>> -> memref<1x32xf32, #tpu.memory_space<any>>
    %122 = tpu.memref_squeeze %121 : memref<1x32xf32, #tpu.memory_space<any>> -> memref<32xf32, #tpu.memory_space<any>>
    %c0_i32_55 = arith.constant 0 : i32
    %123 = tpu.memref_slice %arg5[%c13_i32_52, %c0_i32_55] : memref<16x32xf32, #tpu.memory_space<vmem>> -> memref<1x32xf32, #tpu.memory_space<vmem>>
    %124 = tpu.memref_squeeze %123 : memref<1x32xf32, #tpu.memory_space<vmem>> -> memref<32xf32, #tpu.memory_space<vmem>>
    %125 = tpu.memref_slice %arg6[%c13_i32_53] : memref<16x!tpu.dma_semaphore, #tpu.memory_space<semaphore_mem>> -> memref<1x!tpu.dma_semaphore, #tpu.memory_space<semaphore_mem>>
    %126 = tpu.memref_squeeze %125 : memref<1x!tpu.dma_semaphore, #tpu.memory_space<semaphore_mem>> -> memref<!tpu.dma_semaphore, #tpu.memory_space<semaphore_mem>>
    tpu.enqueue_dma source(%122 : memref<32xf32, #tpu.memory_space<any>>) target(%124 : memref<32xf32, #tpu.memory_space<vmem>>) target_semaphore(%126 : memref<!tpu.dma_semaphore, #tpu.memory_space<semaphore_mem>>)
    %c14_i32 = arith.constant 14 : i32
    %127 = arith.addi %0, %c14_i32 : i32
    %128 = arith.index_cast %127 : i32 to index
    %129 = memref.load %arg1[%128] : memref<32xi32, #tpu.memory_space<smem>>
    %c14_i32_56 = arith.constant 14 : i32
    %c14_i32_57 = arith.constant 14 : i32
    %c0_i32_58 = arith.constant 0 : i32
    %130 = tpu.memref_slice %arg2[%129, %c0_i32_58] : memref<64x32xf32, #tpu.memory_space<any>> -> memref<1x32xf32, #tpu.memory_space<any>>
    %131 = tpu.memref_squeeze %130 : memref<1x32xf32, #tpu.memory_space<any>> -> memref<32xf32, #tpu.memory_space<any>>
    %c0_i32_59 = arith.constant 0 : i32
    %132 = tpu.memref_slice %arg5[%c14_i32_56, %c0_i32_59] : memref<16x32xf32, #tpu.memory_space<vmem>> -> memref<1x32xf32, #tpu.memory_space<vmem>>
    %133 = tpu.memref_squeeze %132 : memref<1x32xf32, #tpu.memory_space<vmem>> -> memref<32xf32, #tpu.memory_space<vmem>>
    %134 = tpu.memref_slice %arg6[%c14_i32_57] : memref<16x!tpu.dma_semaphore, #tpu.memory_space<semaphore_mem>> -> memref<1x!tpu.dma_semaphore, #tpu.memory_space<semaphore_mem>>
    %135 = tpu.memref_squeeze %134 : memref<1x!tpu.dma_semaphore, #tpu.memory_space<semaphore_mem>> -> memref<!tpu.dma_semaphore, #tpu.memory_space<semaphore_mem>>
    tpu.enqueue_dma source(%131 : memref<32xf32, #tpu.memory_space<any>>) target(%133 : memref<32xf32, #tpu.memory_space<vmem>>) target_semaphore(%135 : memref<!tpu.dma_semaphore, #tpu.memory_space<semaphore_mem>>)
    %c15_i32 = arith.constant 15 : i32
    %136 = arith.addi %0, %c15_i32 : i32
    %137 = arith.index_cast %136 : i32 to index
    %138 = memref.load %arg1[%137] : memref<32xi32, #tpu.memory_space<smem>>
    %c15_i32_60 = arith.constant 15 : i32
    %c15_i32_61 = arith.constant 15 : i32
    %c0_i32_62 = arith.constant 0 : i32
    %139 = tpu.memref_slice %arg2[%138, %c0_i32_62] : memref<64x32xf32, #tpu.memory_space<any>> -> memref<1x32xf32, #tpu.memory_space<any>>
    %140 = tpu.memref_squeeze %139 : memref<1x32xf32, #tpu.memory_space<any>> -> memref<32xf32, #tpu.memory_space<any>>
    %c0_i32_63 = arith.constant 0 : i32
    %141 = tpu.memref_slice %arg5[%c15_i32_60, %c0_i32_63] : memref<16x32xf32, #tpu.memory_space<vmem>> -> memref<1x32xf32, #tpu.memory_space<vmem>>
    %142 = tpu.memref_squeeze %141 : memref<1x32xf32, #tpu.memory_space<vmem>> -> memref<32xf32, #tpu.memory_space<vmem>>
    %143 = tpu.memref_slice %arg6[%c15_i32_61] : memref<16x!tpu.dma_semaphore, #tpu.memory_space<semaphore_mem>> -> memref<1x!tpu.dma_semaphore, #tpu.memory_space<semaphore_mem>>
    %144 = tpu.memref_squeeze %143 : memref<1x!tpu.dma_semaphore, #tpu.memory_space<semaphore_mem>> -> memref<!tpu.dma_semaphore, #tpu.memory_space<semaphore_mem>>
    tpu.enqueue_dma source(%140 : memref<32xf32, #tpu.memory_space<any>>) target(%142 : memref<32xf32, #tpu.memory_space<vmem>>) target_semaphore(%144 : memref<!tpu.dma_semaphore, #tpu.memory_space<semaphore_mem>>)
    %c0_i32_64 = arith.constant 0 : i32
    %c0_i32_65 = arith.constant 0 : i32
    %c0_i32_66 = arith.constant 0 : i32
    %c0_i32_67 = arith.constant 0 : i32
    %145 = tpu.memref_slice %arg2[%c0_i32_64, %c0_i32_67] : memref<64x32xf32, #tpu.memory_space<any>> -> memref<1x32xf32, #tpu.memory_space<any>>
    %146 = tpu.memref_squeeze %145 : memref<1x32xf32, #tpu.memory_space<any>> -> memref<32xf32, #tpu.memory_space<any>>
    %c0_i32_68 = arith.constant 0 : i32
    %147 = tpu.memref_slice %arg5[%c0_i32_65, %c0_i32_68] : memref<16x32xf32, #tpu.memory_space<vmem>> -> memref<1x32xf32, #tpu.memory_space<vmem>>
    %148 = tpu.memref_squeeze %147 : memref<1x32xf32, #tpu.memory_space<vmem>> -> memref<32xf32, #tpu.memory_space<vmem>>
    %149 = tpu.memref_slice %arg6[%c0_i32_66] : memref<16x!tpu.dma_semaphore, #tpu.memory_space<semaphore_mem>> -> memref<1x!tpu.dma_semaphore, #tpu.memory_space<semaphore_mem>>
    %150 = tpu.memref_squeeze %149 : memref<1x!tpu.dma_semaphore, #tpu.memory_space<semaphore_mem>> -> memref<!tpu.dma_semaphore, #tpu.memory_space<semaphore_mem>>
    tpu.wait_dma2 semaphore(%150 : memref<!tpu.dma_semaphore, #tpu.memory_space<semaphore_mem>>) src(%146 : memref<32xf32, #tpu.memory_space<any>>) dst(%148 : memref<32xf32, #tpu.memory_space<vmem>>)
    %c0_i32_69 = arith.constant 0 : i32
    %c1_i32_70 = arith.constant 1 : i32
    %c1_i32_71 = arith.constant 1 : i32
    %c0_i32_72 = arith.constant 0 : i32
    %151 = tpu.memref_slice %arg2[%c0_i32_69, %c0_i32_72] : memref<64x32xf32, #tpu.memory_space<any>> -> memref<1x32xf32, #tpu.memory_space<any>>
    %152 = tpu.memref_squeeze %151 : memref<1x32xf32, #tpu.memory_space<any>> -> memref<32xf32, #tpu.memory_space<any>>
    %c0_i32_73 = arith.constant 0 : i32
    %153 = tpu.memref_slice %arg5[%c1_i32_70, %c0_i32_73] : memref<16x32xf32, #tpu.memory_space<vmem>> -> memref<1x32xf32, #tpu.memory_space<vmem>>
    %154 = tpu.memref_squeeze %153 : memref<1x32xf32, #tpu.memory_space<vmem>> -> memref<32xf32, #tpu.memory_space<vmem>>
    %155 = tpu.memref_slice %arg6[%c1_i32_71] : memref<16x!tpu.dma_semaphore, #tpu.memory_space<semaphore_mem>> -> memref<1x!tpu.dma_semaphore, #tpu.memory_space<semaphore_mem>>
    %156 = tpu.memref_squeeze %155 : memref<1x!tpu.dma_semaphore, #tpu.memory_space<semaphore_mem>> -> memref<!tpu.dma_semaphore, #tpu.memory_space<semaphore_mem>>
    tpu.wait_dma2 semaphore(%156 : memref<!tpu.dma_semaphore, #tpu.memory_space<semaphore_mem>>) src(%152 : memref<32xf32, #tpu.memory_space<any>>) dst(%154 : memref<32xf32, #tpu.memory_space<vmem>>)
    %c0_i32_74 = arith.constant 0 : i32
    %c2_i32_75 = arith.constant 2 : i32
    %c2_i32_76 = arith.constant 2 : i32
    %c0_i32_77 = arith.constant 0 : i32
    %157 = tpu.memref_slice %arg2[%c0_i32_74, %c0_i32_77] : memref<64x32xf32, #tpu.memory_space<any>> -> memref<1x32xf32, #tpu.memory_space<any>>
    %158 = tpu.memref_squeeze %157 : memref<1x32xf32, #tpu.memory_space<any>> -> memref<32xf32, #tpu.memory_space<any>>
    %c0_i32_78 = arith.constant 0 : i32
    %159 = tpu.memref_slice %arg5[%c2_i32_75, %c0_i32_78] : memref<16x32xf32, #tpu.memory_space<vmem>> -> memref<1x32xf32, #tpu.memory_space<vmem>>
    %160 = tpu.memref_squeeze %159 : memref<1x32xf32, #tpu.memory_space<vmem>> -> memref<32xf32, #tpu.memory_space<vmem>>
    %161 = tpu.memref_slice %arg6[%c2_i32_76] : memref<16x!tpu.dma_semaphore, #tpu.memory_space<semaphore_mem>> -> memref<1x!tpu.dma_semaphore, #tpu.memory_space<semaphore_mem>>
    %162 = tpu.memref_squeeze %161 : memref<1x!tpu.dma_semaphore, #tpu.memory_space<semaphore_mem>> -> memref<!tpu.dma_semaphore, #tpu.memory_space<semaphore_mem>>
    tpu.wait_dma2 semaphore(%162 : memref<!tpu.dma_semaphore, #tpu.memory_space<semaphore_mem>>) src(%158 : memref<32xf32, #tpu.memory_space<any>>) dst(%160 : memref<32xf32, #tpu.memory_space<vmem>>)
    %c0_i32_79 = arith.constant 0 : i32
    %c3_i32_80 = arith.constant 3 : i32
    %c3_i32_81 = arith.constant 3 : i32
    %c0_i32_82 = arith.constant 0 : i32
    %163 = tpu.memref_slice %arg2[%c0_i32_79, %c0_i32_82] : memref<64x32xf32, #tpu.memory_space<any>> -> memref<1x32xf32, #tpu.memory_space<any>>
    %164 = tpu.memref_squeeze %163 : memref<1x32xf32, #tpu.memory_space<any>> -> memref<32xf32, #tpu.memory_space<any>>
    %c0_i32_83 = arith.constant 0 : i32
    %165 = tpu.memref_slice %arg5[%c3_i32_80, %c0_i32_83] : memref<16x32xf32, #tpu.memory_space<vmem>> -> memref<1x32xf32, #tpu.memory_space<vmem>>
    %166 = tpu.memref_squeeze %165 : memref<1x32xf32, #tpu.memory_space<vmem>> -> memref<32xf32, #tpu.memory_space<vmem>>
    %167 = tpu.memref_slice %arg6[%c3_i32_81] : memref<16x!tpu.dma_semaphore, #tpu.memory_space<semaphore_mem>> -> memref<1x!tpu.dma_semaphore, #tpu.memory_space<semaphore_mem>>
    %168 = tpu.memref_squeeze %167 : memref<1x!tpu.dma_semaphore, #tpu.memory_space<semaphore_mem>> -> memref<!tpu.dma_semaphore, #tpu.memory_space<semaphore_mem>>
    tpu.wait_dma2 semaphore(%168 : memref<!tpu.dma_semaphore, #tpu.memory_space<semaphore_mem>>) src(%164 : memref<32xf32, #tpu.memory_space<any>>) dst(%166 : memref<32xf32, #tpu.memory_space<vmem>>)
    %c0_i32_84 = arith.constant 0 : i32
    %c4_i32_85 = arith.constant 4 : i32
    %c4_i32_86 = arith.constant 4 : i32
    %c0_i32_87 = arith.constant 0 : i32
    %169 = tpu.memref_slice %arg2[%c0_i32_84, %c0_i32_87] : memref<64x32xf32, #tpu.memory_space<any>> -> memref<1x32xf32, #tpu.memory_space<any>>
    %170 = tpu.memref_squeeze %169 : memref<1x32xf32, #tpu.memory_space<any>> -> memref<32xf32, #tpu.memory_space<any>>
    %c0_i32_88 = arith.constant 0 : i32
    %171 = tpu.memref_slice %arg5[%c4_i32_85, %c0_i32_88] : memref<16x32xf32, #tpu.memory_space<vmem>> -> memref<1x32xf32, #tpu.memory_space<vmem>>
    %172 = tpu.memref_squeeze %171 : memref<1x32xf32, #tpu.memory_space<vmem>> -> memref<32xf32, #tpu.memory_space<vmem>>
    %173 = tpu.memref_slice %arg6[%c4_i32_86] : memref<16x!tpu.dma_semaphore, #tpu.memory_space<semaphore_mem>> -> memref<1x!tpu.dma_semaphore, #tpu.memory_space<semaphore_mem>>
    %174 = tpu.memref_squeeze %173 : memref<1x!tpu.dma_semaphore, #tpu.memory_space<semaphore_mem>> -> memref<!tpu.dma_semaphore, #tpu.memory_space<semaphore_mem>>
    tpu.wait_dma2 semaphore(%174 : memref<!tpu.dma_semaphore, #tpu.memory_space<semaphore_mem>>) src(%170 : memref<32xf32, #tpu.memory_space<any>>) dst(%172 : memref<32xf32, #tpu.memory_space<vmem>>)
    %c0_i32_89 = arith.constant 0 : i32
    %c5_i32_90 = arith.constant 5 : i32
    %c5_i32_91 = arith.constant 5 : i32
    %c0_i32_92 = arith.constant 0 : i32
    %175 = tpu.memref_slice %arg2[%c0_i32_89, %c0_i32_92] : memref<64x32xf32, #tpu.memory_space<any>> -> memref<1x32xf32, #tpu.memory_space<any>>
    %176 = tpu.memref_squeeze %175 : memref<1x32xf32, #tpu.memory_space<any>> -> memref<32xf32, #tpu.memory_space<any>>
    %c0_i32_93 = arith.constant 0 : i32
    %177 = tpu.memref_slice %arg5[%c5_i32_90, %c0_i32_93] : memref<16x32xf32, #tpu.memory_space<vmem>> -> memref<1x32xf32, #tpu.memory_space<vmem>>
    %178 = tpu.memref_squeeze %177 : memref<1x32xf32, #tpu.memory_space<vmem>> -> memref<32xf32, #tpu.memory_space<vmem>>
    %179 = tpu.memref_slice %arg6[%c5_i32_91] : memref<16x!tpu.dma_semaphore, #tpu.memory_space<semaphore_mem>> -> memref<1x!tpu.dma_semaphore, #tpu.memory_space<semaphore_mem>>
    %180 = tpu.memref_squeeze %179 : memref<1x!tpu.dma_semaphore, #tpu.memory_space<semaphore_mem>> -> memref<!tpu.dma_semaphore, #tpu.memory_space<semaphore_mem>>
    tpu.wait_dma2 semaphore(%180 : memref<!tpu.dma_semaphore, #tpu.memory_space<semaphore_mem>>) src(%176 : memref<32xf32, #tpu.memory_space<any>>) dst(%178 : memref<32xf32, #tpu.memory_space<vmem>>)
    %c0_i32_94 = arith.constant 0 : i32
    %c6_i32_95 = arith.constant 6 : i32
    %c6_i32_96 = arith.constant 6 : i32
    %c0_i32_97 = arith.constant 0 : i32
    %181 = tpu.memref_slice %arg2[%c0_i32_94, %c0_i32_97] : memref<64x32xf32, #tpu.memory_space<any>> -> memref<1x32xf32, #tpu.memory_space<any>>
    %182 = tpu.memref_squeeze %181 : memref<1x32xf32, #tpu.memory_space<any>> -> memref<32xf32, #tpu.memory_space<any>>
    %c0_i32_98 = arith.constant 0 : i32
    %183 = tpu.memref_slice %arg5[%c6_i32_95, %c0_i32_98] : memref<16x32xf32, #tpu.memory_space<vmem>> -> memref<1x32xf32, #tpu.memory_space<vmem>>
    %184 = tpu.memref_squeeze %183 : memref<1x32xf32, #tpu.memory_space<vmem>> -> memref<32xf32, #tpu.memory_space<vmem>>
    %185 = tpu.memref_slice %arg6[%c6_i32_96] : memref<16x!tpu.dma_semaphore, #tpu.memory_space<semaphore_mem>> -> memref<1x!tpu.dma_semaphore, #tpu.memory_space<semaphore_mem>>
    %186 = tpu.memref_squeeze %185 : memref<1x!tpu.dma_semaphore, #tpu.memory_space<semaphore_mem>> -> memref<!tpu.dma_semaphore, #tpu.memory_space<semaphore_mem>>
    tpu.wait_dma2 semaphore(%186 : memref<!tpu.dma_semaphore, #tpu.memory_space<semaphore_mem>>) src(%182 : memref<32xf32, #tpu.memory_space<any>>) dst(%184 : memref<32xf32, #tpu.memory_space<vmem>>)
    %c0_i32_99 = arith.constant 0 : i32
    %c7_i32_100 = arith.constant 7 : i32
    %c7_i32_101 = arith.constant 7 : i32
    %c0_i32_102 = arith.constant 0 : i32
    %187 = tpu.memref_slice %arg2[%c0_i32_99, %c0_i32_102] : memref<64x32xf32, #tpu.memory_space<any>> -> memref<1x32xf32, #tpu.memory_space<any>>
    %188 = tpu.memref_squeeze %187 : memref<1x32xf32, #tpu.memory_space<any>> -> memref<32xf32, #tpu.memory_space<any>>
    %c0_i32_103 = arith.constant 0 : i32
    %189 = tpu.memref_slice %arg5[%c7_i32_100, %c0_i32_103] : memref<16x32xf32, #tpu.memory_space<vmem>> -> memref<1x32xf32, #tpu.memory_space<vmem>>
    %190 = tpu.memref_squeeze %189 : memref<1x32xf32, #tpu.memory_space<vmem>> -> memref<32xf32, #tpu.memory_space<vmem>>
    %191 = tpu.memref_slice %arg6[%c7_i32_101] : memref<16x!tpu.dma_semaphore, #tpu.memory_space<semaphore_mem>> -> memref<1x!tpu.dma_semaphore, #tpu.memory_space<semaphore_mem>>
    %192 = tpu.memref_squeeze %191 : memref<1x!tpu.dma_semaphore, #tpu.memory_space<semaphore_mem>> -> memref<!tpu.dma_semaphore, #tpu.memory_space<semaphore_mem>>
    tpu.wait_dma2 semaphore(%192 : memref<!tpu.dma_semaphore, #tpu.memory_space<semaphore_mem>>) src(%188 : memref<32xf32, #tpu.memory_space<any>>) dst(%190 : memref<32xf32, #tpu.memory_space<vmem>>)
    %c0_i32_104 = arith.constant 0 : i32
    %c8_i32_105 = arith.constant 8 : i32
    %c8_i32_106 = arith.constant 8 : i32
    %c0_i32_107 = arith.constant 0 : i32
    %193 = tpu.memref_slice %arg2[%c0_i32_104, %c0_i32_107] : memref<64x32xf32, #tpu.memory_space<any>> -> memref<1x32xf32, #tpu.memory_space<any>>
    %194 = tpu.memref_squeeze %193 : memref<1x32xf32, #tpu.memory_space<any>> -> memref<32xf32, #tpu.memory_space<any>>
    %c0_i32_108 = arith.constant 0 : i32
    %195 = tpu.memref_slice %arg5[%c8_i32_105, %c0_i32_108] : memref<16x32xf32, #tpu.memory_space<vmem>> -> memref<1x32xf32, #tpu.memory_space<vmem>>
    %196 = tpu.memref_squeeze %195 : memref<1x32xf32, #tpu.memory_space<vmem>> -> memref<32xf32, #tpu.memory_space<vmem>>
    %197 = tpu.memref_slice %arg6[%c8_i32_106] : memref<16x!tpu.dma_semaphore, #tpu.memory_space<semaphore_mem>> -> memref<1x!tpu.dma_semaphore, #tpu.memory_space<semaphore_mem>>
    %198 = tpu.memref_squeeze %197 : memref<1x!tpu.dma_semaphore, #tpu.memory_space<semaphore_mem>> -> memref<!tpu.dma_semaphore, #tpu.memory_space<semaphore_mem>>
    tpu.wait_dma2 semaphore(%198 : memref<!tpu.dma_semaphore, #tpu.memory_space<semaphore_mem>>) src(%194 : memref<32xf32, #tpu.memory_space<any>>) dst(%196 : memref<32xf32, #tpu.memory_space<vmem>>)
    %c0_i32_109 = arith.constant 0 : i32
    %c9_i32_110 = arith.constant 9 : i32
    %c9_i32_111 = arith.constant 9 : i32
    %c0_i32_112 = arith.constant 0 : i32
    %199 = tpu.memref_slice %arg2[%c0_i32_109, %c0_i32_112] : memref<64x32xf32, #tpu.memory_space<any>> -> memref<1x32xf32, #tpu.memory_space<any>>
    %200 = tpu.memref_squeeze %199 : memref<1x32xf32, #tpu.memory_space<any>> -> memref<32xf32, #tpu.memory_space<any>>
    %c0_i32_113 = arith.constant 0 : i32
    %201 = tpu.memref_slice %arg5[%c9_i32_110, %c0_i32_113] : memref<16x32xf32, #tpu.memory_space<vmem>> -> memref<1x32xf32, #tpu.memory_space<vmem>>
    %202 = tpu.memref_squeeze %201 : memref<1x32xf32, #tpu.memory_space<vmem>> -> memref<32xf32, #tpu.memory_space<vmem>>
    %203 = tpu.memref_slice %arg6[%c9_i32_111] : memref<16x!tpu.dma_semaphore, #tpu.memory_space<semaphore_mem>> -> memref<1x!tpu.dma_semaphore, #tpu.memory_space<semaphore_mem>>
    %204 = tpu.memref_squeeze %203 : memref<1x!tpu.dma_semaphore, #tpu.memory_space<semaphore_mem>> -> memref<!tpu.dma_semaphore, #tpu.memory_space<semaphore_mem>>
    tpu.wait_dma2 semaphore(%204 : memref<!tpu.dma_semaphore, #tpu.memory_space<semaphore_mem>>) src(%200 : memref<32xf32, #tpu.memory_space<any>>) dst(%202 : memref<32xf32, #tpu.memory_space<vmem>>)
    %c0_i32_114 = arith.constant 0 : i32
    %c10_i32_115 = arith.constant 10 : i32
    %c10_i32_116 = arith.constant 10 : i32
    %c0_i32_117 = arith.constant 0 : i32
    %205 = tpu.memref_slice %arg2[%c0_i32_114, %c0_i32_117] : memref<64x32xf32, #tpu.memory_space<any>> -> memref<1x32xf32, #tpu.memory_space<any>>
    %206 = tpu.memref_squeeze %205 : memref<1x32xf32, #tpu.memory_space<any>> -> memref<32xf32, #tpu.memory_space<any>>
    %c0_i32_118 = arith.constant 0 : i32
    %207 = tpu.memref_slice %arg5[%c10_i32_115, %c0_i32_118] : memref<16x32xf32, #tpu.memory_space<vmem>> -> memref<1x32xf32, #tpu.memory_space<vmem>>
    %208 = tpu.memref_squeeze %207 : memref<1x32xf32, #tpu.memory_space<vmem>> -> memref<32xf32, #tpu.memory_space<vmem>>
    %209 = tpu.memref_slice %arg6[%c10_i32_116] : memref<16x!tpu.dma_semaphore, #tpu.memory_space<semaphore_mem>> -> memref<1x!tpu.dma_semaphore, #tpu.memory_space<semaphore_mem>>
    %210 = tpu.memref_squeeze %209 : memref<1x!tpu.dma_semaphore, #tpu.memory_space<semaphore_mem>> -> memref<!tpu.dma_semaphore, #tpu.memory_space<semaphore_mem>>
    tpu.wait_dma2 semaphore(%210 : memref<!tpu.dma_semaphore, #tpu.memory_space<semaphore_mem>>) src(%206 : memref<32xf32, #tpu.memory_space<any>>) dst(%208 : memref<32xf32, #tpu.memory_space<vmem>>)
    %c0_i32_119 = arith.constant 0 : i32
    %c11_i32_120 = arith.constant 11 : i32
    %c11_i32_121 = arith.constant 11 : i32
    %c0_i32_122 = arith.constant 0 : i32
    %211 = tpu.memref_slice %arg2[%c0_i32_119, %c0_i32_122] : memref<64x32xf32, #tpu.memory_space<any>> -> memref<1x32xf32, #tpu.memory_space<any>>
    %212 = tpu.memref_squeeze %211 : memref<1x32xf32, #tpu.memory_space<any>> -> memref<32xf32, #tpu.memory_space<any>>
    %c0_i32_123 = arith.constant 0 : i32
    %213 = tpu.memref_slice %arg5[%c11_i32_120, %c0_i32_123] : memref<16x32xf32, #tpu.memory_space<vmem>> -> memref<1x32xf32, #tpu.memory_space<vmem>>
    %214 = tpu.memref_squeeze %213 : memref<1x32xf32, #tpu.memory_space<vmem>> -> memref<32xf32, #tpu.memory_space<vmem>>
    %215 = tpu.memref_slice %arg6[%c11_i32_121] : memref<16x!tpu.dma_semaphore, #tpu.memory_space<semaphore_mem>> -> memref<1x!tpu.dma_semaphore, #tpu.memory_space<semaphore_mem>>
    %216 = tpu.memref_squeeze %215 : memref<1x!tpu.dma_semaphore, #tpu.memory_space<semaphore_mem>> -> memref<!tpu.dma_semaphore, #tpu.memory_space<semaphore_mem>>
    tpu.wait_dma2 semaphore(%216 : memref<!tpu.dma_semaphore, #tpu.memory_space<semaphore_mem>>) src(%212 : memref<32xf32, #tpu.memory_space<any>>) dst(%214 : memref<32xf32, #tpu.memory_space<vmem>>)
    %c0_i32_124 = arith.constant 0 : i32
    %c12_i32_125 = arith.constant 12 : i32
    %c12_i32_126 = arith.constant 12 : i32
    %c0_i32_127 = arith.constant 0 : i32
    %217 = tpu.memref_slice %arg2[%c0_i32_124, %c0_i32_127] : memref<64x32xf32, #tpu.memory_space<any>> -> memref<1x32xf32, #tpu.memory_space<any>>
    %218 = tpu.memref_squeeze %217 : memref<1x32xf32, #tpu.memory_space<any>> -> memref<32xf32, #tpu.memory_space<any>>
    %c0_i32_128 = arith.constant 0 : i32
    %219 = tpu.memref_slice %arg5[%c12_i32_125, %c0_i32_128] : memref<16x32xf32, #tpu.memory_space<vmem>> -> memref<1x32xf32, #tpu.memory_space<vmem>>
    %220 = tpu.memref_squeeze %219 : memref<1x32xf32, #tpu.memory_space<vmem>> -> memref<32xf32, #tpu.memory_space<vmem>>
    %221 = tpu.memref_slice %arg6[%c12_i32_126] : memref<16x!tpu.dma_semaphore, #tpu.memory_space<semaphore_mem>> -> memref<1x!tpu.dma_semaphore, #tpu.memory_space<semaphore_mem>>
    %222 = tpu.memref_squeeze %221 : memref<1x!tpu.dma_semaphore, #tpu.memory_space<semaphore_mem>> -> memref<!tpu.dma_semaphore, #tpu.memory_space<semaphore_mem>>
    tpu.wait_dma2 semaphore(%222 : memref<!tpu.dma_semaphore, #tpu.memory_space<semaphore_mem>>) src(%218 : memref<32xf32, #tpu.memory_space<any>>) dst(%220 : memref<32xf32, #tpu.memory_space<vmem>>)
    %c0_i32_129 = arith.constant 0 : i32
    %c13_i32_130 = arith.constant 13 : i32
    %c13_i32_131 = arith.constant 13 : i32
    %c0_i32_132 = arith.constant 0 : i32
    %223 = tpu.memref_slice %arg2[%c0_i32_129, %c0_i32_132] : memref<64x32xf32, #tpu.memory_space<any>> -> memref<1x32xf32, #tpu.memory_space<any>>
    %224 = tpu.memref_squeeze %223 : memref<1x32xf32, #tpu.memory_space<any>> -> memref<32xf32, #tpu.memory_space<any>>
    %c0_i32_133 = arith.constant 0 : i32
    %225 = tpu.memref_slice %arg5[%c13_i32_130, %c0_i32_133] : memref<16x32xf32, #tpu.memory_space<vmem>> -> memref<1x32xf32, #tpu.memory_space<vmem>>
    %226 = tpu.memref_squeeze %225 : memref<1x32xf32, #tpu.memory_space<vmem>> -> memref<32xf32, #tpu.memory_space<vmem>>
    %227 = tpu.memref_slice %arg6[%c13_i32_131] : memref<16x!tpu.dma_semaphore, #tpu.memory_space<semaphore_mem>> -> memref<1x!tpu.dma_semaphore, #tpu.memory_space<semaphore_mem>>
    %228 = tpu.memref_squeeze %227 : memref<1x!tpu.dma_semaphore, #tpu.memory_space<semaphore_mem>> -> memref<!tpu.dma_semaphore, #tpu.memory_space<semaphore_mem>>
    tpu.wait_dma2 semaphore(%228 : memref<!tpu.dma_semaphore, #tpu.memory_space<semaphore_mem>>) src(%224 : memref<32xf32, #tpu.memory_space<any>>) dst(%226 : memref<32xf32, #tpu.memory_space<vmem>>)
    %c0_i32_134 = arith.constant 0 : i32
    %c14_i32_135 = arith.constant 14 : i32
    %c14_i32_136 = arith.constant 14 : i32
    %c0_i32_137 = arith.constant 0 : i32
    %229 = tpu.memref_slice %arg2[%c0_i32_134, %c0_i32_137] : memref<64x32xf32, #tpu.memory_space<any>> -> memref<1x32xf32, #tpu.memory_space<any>>
    %230 = tpu.memref_squeeze %229 : memref<1x32xf32, #tpu.memory_space<any>> -> memref<32xf32, #tpu.memory_space<any>>
    %c0_i32_138 = arith.constant 0 : i32
    %231 = tpu.memref_slice %arg5[%c14_i32_135, %c0_i32_138] : memref<16x32xf32, #tpu.memory_space<vmem>> -> memref<1x32xf32, #tpu.memory_space<vmem>>
    %232 = tpu.memref_squeeze %231 : memref<1x32xf32, #tpu.memory_space<vmem>> -> memref<32xf32, #tpu.memory_space<vmem>>
    %233 = tpu.memref_slice %arg6[%c14_i32_136] : memref<16x!tpu.dma_semaphore, #tpu.memory_space<semaphore_mem>> -> memref<1x!tpu.dma_semaphore, #tpu.memory_space<semaphore_mem>>
    %234 = tpu.memref_squeeze %233 : memref<1x!tpu.dma_semaphore, #tpu.memory_space<semaphore_mem>> -> memref<!tpu.dma_semaphore, #tpu.memory_space<semaphore_mem>>
    tpu.wait_dma2 semaphore(%234 : memref<!tpu.dma_semaphore, #tpu.memory_space<semaphore_mem>>) src(%230 : memref<32xf32, #tpu.memory_space<any>>) dst(%232 : memref<32xf32, #tpu.memory_space<vmem>>)
    %c0_i32_139 = arith.constant 0 : i32
    %c15_i32_140 = arith.constant 15 : i32
    %c15_i32_141 = arith.constant 15 : i32
    %c0_i32_142 = arith.constant 0 : i32
    %235 = tpu.memref_slice %arg2[%c0_i32_139, %c0_i32_142] : memref<64x32xf32, #tpu.memory_space<any>> -> memref<1x32xf32, #tpu.memory_space<any>>
    %236 = tpu.memref_squeeze %235 : memref<1x32xf32, #tpu.memory_space<any>> -> memref<32xf32, #tpu.memory_space<any>>
    %c0_i32_143 = arith.constant 0 : i32
    %237 = tpu.memref_slice %arg5[%c15_i32_140, %c0_i32_143] : memref<16x32xf32, #tpu.memory_space<vmem>> -> memref<1x32xf32, #tpu.memory_space<vmem>>
    %238 = tpu.memref_squeeze %237 : memref<1x32xf32, #tpu.memory_space<vmem>> -> memref<32xf32, #tpu.memory_space<vmem>>
    %239 = tpu.memref_slice %arg6[%c15_i32_141] : memref<16x!tpu.dma_semaphore, #tpu.memory_space<semaphore_mem>> -> memref<1x!tpu.dma_semaphore, #tpu.memory_space<semaphore_mem>>
    %240 = tpu.memref_squeeze %239 : memref<1x!tpu.dma_semaphore, #tpu.memory_space<semaphore_mem>> -> memref<!tpu.dma_semaphore, #tpu.memory_space<semaphore_mem>>
    tpu.wait_dma2 semaphore(%240 : memref<!tpu.dma_semaphore, #tpu.memory_space<semaphore_mem>>) src(%236 : memref<32xf32, #tpu.memory_space<any>>) dst(%238 : memref<32xf32, #tpu.memory_space<vmem>>)
    %c0 = arith.constant 0 : index
    %c0_144 = arith.constant 0 : index
    %241 = vector.load %arg5[%c0, %c0_144] : memref<16x32xf32, #tpu.memory_space<vmem>>, vector<16x32xf32>
    %cst = arith.constant 5.65685415 : f32
    %242 = vector.broadcast %cst : f32 to vector<16x32xf32>
    %243 = arith.mulf %241, %242 : vector<16x32xf32>
    %c0_145 = arith.constant 0 : index
    %c0_146 = arith.constant 0 : index
    %244 = vector.load %arg3[%c0_145, %c0_146] : memref<16x32xf32, #tpu.memory_space<vmem>>, vector<16x32xf32>
    %245 = arith.addf %243, %244 : vector<16x32xf32>
    %c0_147 = arith.constant 0 : index
    %c0_148 = arith.constant 0 : index
    %246 = vector.load %arg4[%c0_147, %c0_148] : memref<16x32xf32, #tpu.memory_space<vmem>>, vector<16x32xf32>
    tpu.vector_store %arg4[%c0_147, %c0_148], %245 {strides = array<i32>} : memref<16x32xf32, #tpu.memory_space<vmem>>, vector<16x32xf32>,
    return
  }
  func.func @transform_1(%arg0: i32, %arg1: memref<32xi32, #tpu.memory_space<smem>>) -> (i32, i32) {
    %c1_i32 = arith.constant 1 : i32
    %c0_i32 = arith.constant 0 : i32
    %0 = arith.cmpi eq, %c1_i32, %c0_i32 : i32
    %c1_i32_0 = arith.constant 1 : i32
    %1 = arith.select %0, %c1_i32_0, %c1_i32 : i32
    %2 = arith.remsi %arg0, %1 : i32
    %c0_i32_1 = arith.constant 0 : i32
    %3 = arith.cmpi ne, %2, %c0_i32_1 : i32
    %c0_i32_2 = arith.constant 0 : i32
    %4 = arith.cmpi slt, %2, %c0_i32_2 : i32
    %c0_i32_3 = arith.constant 0 : i32
    %5 = arith.cmpi slt, %1, %c0_i32_3 : i32
    %6 = arith.xori %4, %5 : i1
    %7 = arith.andi %6, %3 : i1
    %8 = arith.addi %2, %1 : i32
    %9 = arith.select %7, %8, %2 : i32
    %c0_i32_4 = arith.constant 0 : i32
    %c0_i32_5 = arith.constant 0 : i32
    return %9, %c0_i32_4 : i32, i32
  }
  func.func @transform_2(%arg0: i32, %arg1: memref<32xi32, #tpu.memory_space<smem>>) -> (i32, i32) {
    %c0_i32 = arith.constant 0 : i32
    %c0_i32_0 = arith.constant 0 : i32
    return %arg0, %c0_i32 : i32, i32
  }
}

</mosaic_0001>

<bundles_post_ra>
// kernel: tpu_custom_call.1
= control target key start
LH: loop header
LB: loop body
LE: loop exit
PB: predicated region body
PF: predicated region fallthrough
CT: control target
= control target key end

     0   :  { %s1681_s0 = inlined_call_operand.vmem [shape: s32[32], index: 0, kind: input, shape index: {}]   ;;  %s1682_s1 = inlined_call_operand.vmem [shape: f32[64,32], index: 1, kind: input, shape index: {}]   ;;  %s1683_s2 = inlined_call_operand.vmem [shape: f32[16,32], index: 2, kind: input, shape index: {}]   ;;  %s1684_s3 = inlined_call_operand.hbm [shape: f32[32,32], index: 3, kind: output, shape index: {}]  }
   0x1   :  { %s8_s14 = sshll.u32 %s1681_s0, 4  ;;  %s9_s14 = int_to_ptr.vmem [resolvable:$true] %s8_s14 }
   0x2   :  { %s1364_s15 = scalar_lea.vmem %s9_s14, 16  ;;  %p1369_p1 = scmp.lt.s32.totalorder %s9_s14, %s9_s14 }
   0x3   :  { %p1365_p0 = scmp.ne.s32.totalorder %s9_s14, %s1364_s15  ;;  %p1370_p2 = scmp.lt.s32.totalorder %s1364_s15, %s1364_s15 }
   0x5   :  { %p1371_p3 = por %p1370_p2, %p1369_p1 }
   0x7   :  { %p1372_p4 = pnand %p1371_p3, %p1365_p0 }
   0x9   :  { %1375 = shalt.err (!%p1372_p4)  }
   0xa   :  { %s1474_s16 = smov [#allocation5]  }
   0xb   :  { %11 = dma.vmem_to_smem %s9_s14, 16, %s1474_s16, [#allocation4] }
   0xc   :  { %1420 = dma.done.wait [#allocation4], 16 }
   0xd   :  { %1421 = vsyncadd [#allocation4], 4294967280 }
   0xe   :  { %13 = sfence }
   0xf   :  { %14 = vsyncpa [#allocation7], 0 }
  0x10   :  { %16 = vsyncpa [#allocation7 + $0x1], 0  ;;  %s1501_s17 = smov 0   ;;  %s1503_s18 = smov 0  }
  0x11   :  { %s1505_s0 = smov 0   ;;  %s1507_s19 = smov 0  }
  0x12 LB: > { %s1522_s20 = sadd.s32 4294967295, %s1472_s19   ;;  %s1295_s21 = sadd.s32 4294967294, %s1472_s19   ;;  %s1472_s19 = sphi %s1507_s19, %s1690_s19   ;;  %s1468_s0 = sphi %s1505_s0, %s1689_s0   ;;  %s1464_s18 = sphi %s1503_s18, %s1688_s18   ;;  %s1460_s17 = sphi %s1501_s17, %s1687_s17  }
  0x13   : > { %s1526_s22 = sadd.s32 1, %s1472_s19   ;;  %s50_s23 = sadd.s32 1, %s1468_s0 }
  0x14   : > { %s47_s24 = ssub.s32 %s1472_s19, %s1526_s22  ;;  %p60_p5 = scmp.ne.s32.totalorder %s1468_s0, %s1464_s18 }
  0x15   : > { %p48_p6 = scmp.eq.s32.totalorder %s47_s24, 0  ;;  %p61_p7 = scmp.eq.s32.totalorder %s1522_s20, 1 }
  0x16   : > { %p66_p8 = scmp.ne.s32.totalorder %s1464_s18, %s1460_s17  ;;  %p67_p9 = scmp.eq.s32.totalorder %s1295_s21, 1 }
  0x17   : > { %s1537_s25 = scalar_select %p48_p6, %s1468_s0, %s50_s23  }
  0x18   : > { %p1539_p10 = por %p61_p7, %p60_p5  ;;  %p1543_p11 = por %p67_p9, %p66_p8 }
  0x19   : > { %p1297_p12 = scmp.ge.s32.totalorder %s1472_s19, 1  ;;  %p88_p13 = scmp.lt.s32.totalorder %s1472_s19, 3 }
  0x1b   : > { %p89_p0 = pnand %p1297_p12, %p88_p13 }
  0x1c   : > { %s100_s28 = sand.u32 (!%p89_p0), 1, %s1464_s18   ;;  %s1551_s29 = sshll.u32 (!%p89_p0), %s1522_s20, 4 }
  0x1d   : > { %92 = sbr.rel (%p89_p0) target bundleno = 247 (0xf7), region = 24  ;;  %s1298_s30 = sshll.u32 (!%p89_p0), %s100_s28, 4 }
  0x1e   : > { %s105_s4 = sld [smem:[#allocation5 + %s1551_s29]] (!%p89_p0)  ;;  %s1559_s8 = scalar_lea.vmem (!%p89_p0), [#allocation6], %s1298_s30 }
  0x24   : > { %s106_s7 = scalar_lea.vmem %s1682_s1, %s105_s4 }
  0x25   : > { %v124_v0 = vld [vmem:[%s106_s7] sm:$0x1] }
  0x26   : > { %125 = vst [vmem:[#allocation2] sm:$0x1] %v124_v0 }
  0x27   : > { %150 = vsyncadd [#allocation3], 16  ;;  %s151_s9 = sadd.s32 1, %s1551_s29 }
  0x28   : > { %s152_s10 = sld [smem:[#allocation5 + %s151_s9]] }
  0x2e   : > { %s153_s13 = scalar_lea.vmem %s1682_s1, %s152_s10 }
  0x2f   : > { %v173_v1 = vld [vmem:[%s153_s13] sm:$0x1] }
  0x30   : > { %174 = vst [vmem:[#allocation2 + $0x1] sm:$0x1] %v173_v1 }
  0x31   : > { %199 = vsyncadd [#allocation3 + $0x1], 16  ;;  %s200_s14 = sadd.s32 2, %s1551_s29 }
  0x32   : > { %s201_s15 = sld [smem:[#allocation5 + %s200_s14]] }
  0x38   : > { %s202_s23 = scalar_lea.vmem %s1682_s1, %s201_s15 }
  0x39   : > { %v222_v2 = vld [vmem:[%s202_s23] sm:$0x1] }
  0x3a   : > { %223 = vst [vmem:[#allocation2 + $0x2] sm:$0x1] %v222_v2 }
  0x3b   : > { %248 = vsyncadd [#allocation3 + $0x2], 16  ;;  %s249_s24 = sadd.s32 3, %s1551_s29 }
  0x3c   : > { %s250_s30 = sld [smem:[#allocation5 + %s249_s24]] }
  0x42   : > { %s251_s6 = scalar_lea.vmem %s1682_s1, %s250_s30 }
  0x43   : > { %v271_v3 = vld [vmem:[%s251_s6] sm:$0x1] }
  0x44   : > { %272 = vst [vmem:[#allocation2 + $0x3] sm:$0x1] %v271_v3 }
  0x45   : > { %297 = vsyncadd [#allocation3 + $0x3], 16  ;;  %s298_s7 = sadd.s32 4, %s1551_s29 }
  0x46   : > { %s299_s9 = sld [smem:[#allocation5 + %s298_s7]] }
  0x4c   : > { %s300_s12 = scalar_lea.vmem %s1682_s1, %s299_s9 }
  0x4d   : > { %v320_v4 = vld [vmem:[%s300_s12] sm:$0x1] }
  0x4e   : > { %321 = vst [vmem:[#allocation2 + $0x4] sm:$0x1] %v320_v4 }
  0x4f   : > { %346 = vsyncadd [#allocation3 + $0x4], 16  ;;  %s347_s13 = sadd.s32 5, %s1551_s29 }
  0x50   : > { %s348_s14 = sld [smem:[#allocation5 + %s347_s13]] }
  0x56   : > { %s349_s21 = scalar_lea.vmem %s1682_s1, %s348_s14 }
  0x57   : > { %v369_v5 = vld [vmem:[%s349_s21] sm:$0x1] }
  0x58   : > { %370 = vst [vmem:[#allocation2 + $0x5] sm:$0x1] %v369_v5 }
  0x59   : > { %395 = vsyncadd [#allocation3 + $0x5], 16  ;;  %s396_s23 = sadd.s32 6, %s1551_s29 }
  0x5a   : > { %s397_s24 = sld [smem:[#allocation5 + %s396_s23]] }
  0x60   : > { %s398_s5 = scalar_lea.vmem %s1682_s1, %s397_s24 }
  0x61   : > { %v418_v6 = vld [vmem:[%s398_s5] sm:$0x1] }
  0x62   : > { %419 = vst [vmem:[#allocation2 + $0x6] sm:$0x1] %v418_v6 }
  0x63   : > { %444 = vsyncadd [#allocation3 + $0x6], 16  ;;  %s445_s6 = sadd.s32 7, %s1551_s29 }
  0x64   : > { %s446_s7 = sld [smem:[#allocation5 + %s445_s6]] }
  0x6a   : > { %s447_s11 = scalar_lea.vmem %s1682_s1, %s446_s7 }
  0x6b   : > { %v467_v7 = vld [vmem:[%s447_s11] sm:$0x1] }
  0x6c   : > { %468 = vst [vmem:[#allocation2 + $0x7] sm:$0x1] %v467_v7 }
  0x6d   : > { %493 = vsyncadd [#allocation3 + $0x7], 16  ;;  %s494_s12 = sadd.s32 8, %s1551_s29 }
  0x6e   : > { %s495_s13 = sld [smem:[#allocation5 + %s494_s12]] }
  0x74   : > { %s496_s16 = scalar_lea.vmem %s1682_s1, %s495_s13 }
  0x75   : > { %v516_v8 = vld [vmem:[%s496_s16] sm:$0x1] }
  0x76   : > { %517 = vst [vmem:[#allocation2 + $0x8] sm:$0x1] %v516_v8 }
  0x77   : > { %542 = vsyncadd [#allocation3 + $0x8], 16  ;;  %s543_s21 = sadd.s32 9, %s1551_s29 }
  0x78   : > { %s544_s23 = sld [smem:[#allocation5 + %s543_s21]] }
  0x7e   : > { %s545_s4 = scalar_lea.vmem %s1682_s1, %s544_s23 }
  0x7f   : > { %v565_v9 = vld [vmem:[%s545_s4] sm:$0x1] }
  0x80   : > { %566 = vst [vmem:[#allocation2 + $0x9] sm:$0x1] %v565_v9 }
  0x81   : > { %591 = vsyncadd [#allocation3 + $0x9], 16  ;;  %s592_s5 = sadd.s32 10, %s1551_s29 }
  0x82   : > { %s593_s6 = sld [smem:[#allocation5 + %s592_s5]] }
  0x88   : > { %s594_s10 = scalar_lea.vmem %s1682_s1, %s593_s6 }
  0x89   : > { %v614_v10 = vld [vmem:[%s594_s10] sm:$0x1] }
  0x8a   : > { %615 = vst [vmem:[#allocation2 + $0xa] sm:$0x1] %v614_v10 }
  0x8b   : > { %640 = vsyncadd [#allocation3 + $0xa], 16  ;;  %s641_s11 = sadd.s32 11, %s1551_s29 }
  0x8c   : > { %s642_s12 = sld [smem:[#allocation5 + %s641_s11]] }
  0x92   : > { %s643_s15 = scalar_lea.vmem %s1682_s1, %s642_s12 }
  0x93   : > { %v663_v11 = vld [vmem:[%s643_s15] sm:$0x1] }
  0x94   : > { %664 = vst [vmem:[#allocation2 + $0xb] sm:$0x1] %v663_v11 }
  0x95   : > { %689 = vsyncadd [#allocation3 + $0xb], 16  ;;  %s690_s16 = sadd.s32 12, %s1551_s29 }
  0x96   : > { %s691_s21 = sld [smem:[#allocation5 + %s690_s16]] }
  0x9c   : > { %s692_s30 = scalar_lea.vmem %s1682_s1, %s691_s21 }
  0x9d   : > { %v712_v12 = vld [vmem:[%s692_s30] sm:$0x1] }
  0x9e   : > { %713 = vst [vmem:[#allocation2 + $0xc] sm:$0x1] %v712_v12 }
  0x9f   : > { %738 = vsyncadd [#allocation3 + $0xc], 16  ;;  %s739_s4 = sadd.s32 13, %s1551_s29 }
  0xa0   : > { %s740_s5 = sld [smem:[#allocation5 + %s739_s4]] }
  0xa6   : > { %s741_s9 = scalar_lea.vmem %s1682_s1, %s740_s5 }
  0xa7   : > { %v761_v13 = vld [vmem:[%s741_s9] sm:$0x1] }
  0xa8   : > { %762 = vst [vmem:[#allocation2 + $0xd] sm:$0x1] %v761_v13 }
  0xa9   : > { %787 = vsyncadd [#allocation3 + $0xd], 16  ;;  %s788_s10 = sadd.s32 14, %s1551_s29 }
  0xaa   : > { %s789_s11 = sld [smem:[#allocation5 + %s788_s10]] }
  0xb0   : > { %s790_s14 = scalar_lea.vmem %s1682_s1, %s789_s11 }
  0xb1   : > { %v810_v14 = vld [vmem:[%s790_s14] sm:$0x1] }
  0xb2   : > { %811 = vst [vmem:[#allocation2 + $0xe] sm:$0x1] %v810_v14 }
  0xb3   : > { %836 = vsyncadd [#allocation3 + $0xe], 16  ;;  %s837_s15 = sadd.s32 15, %s1551_s29 }
  0xb4   : > { %s838_s16 = sld [smem:[#allocation5 + %s837_s15]] }
  0xba   : > { %s839_s24 = scalar_lea.vmem %s1682_s1, %s838_s16 }
  0xbb   : > { %v859_v15 = vld [vmem:[%s839_s24] sm:$0x1] }
  0xbc   : > { %860 = vst [vmem:[#allocation2 + $0xf] sm:$0x1] %v859_v15 }
  0xbd   : > { %885 = vsyncadd [#allocation3 + $0xf], 16 }
  0xbe   : > { %1422 = dma.done.wait [#allocation3], 16 }
  0xbf   : > { %1423 = vsyncadd [#allocation3], 4294967280 }
  0xc0   : > { %1424 = dma.done.wait [#allocation3 + $0x1], 16 }
  0xc1   : > { %1425 = vsyncadd [#allocation3 + $0x1], 4294967280 }
  0xc2   : > { %1426 = dma.done.wait [#allocation3 + $0x2], 16 }
  0xc3   : > { %1427 = vsyncadd [#allocation3 + $0x2], 4294967280 }
  0xc4   : > { %1428 = dma.done.wait [#allocation3 + $0x3], 16 }
  0xc5   : > { %1429 = vsyncadd [#allocation3 + $0x3], 4294967280 }
  0xc6   : > { %1430 = dma.done.wait [#allocation3 + $0x4], 16 }
  0xc7   : > { %1431 = vsyncadd [#allocation3 + $0x4], 4294967280 }
  0xc8   : > { %1432 = dma.done.wait [#allocation3 + $0x5], 16 }
  0xc9   : > { %1433 = vsyncadd [#allocation3 + $0x5], 4294967280 }
  0xca   : > { %1434 = dma.done.wait [#allocation3 + $0x6], 16 }
  0xcb   : > { %1435 = vsyncadd [#allocation3 + $0x6], 4294967280 }
  0xcc   : > { %1436 = dma.done.wait [#allocation3 + $0x7], 16 }
  0xcd   : > { %1437 = vsyncadd [#allocation3 + $0x7], 4294967280 }
  0xce   : > { %1438 = dma.done.wait [#allocation3 + $0x8], 16 }
  0xcf   : > { %1439 = vsyncadd [#allocation3 + $0x8], 4294967280 }
  0xd0   : > { %1440 = dma.done.wait [#allocation3 + $0x9], 16 }
  0xd1   : > { %1441 = vsyncadd [#allocation3 + $0x9], 4294967280 }
  0xd2   : > { %1442 = dma.done.wait [#allocation3 + $0xa], 16 }
  0xd3   : > { %1443 = vsyncadd [#allocation3 + $0xa], 4294967280 }
  0xd4   : > { %1444 = dma.done.wait [#allocation3 + $0xb], 16 }
  0xd5   : > { %1445 = vsyncadd [#allocation3 + $0xb], 4294967280 }
  0xd6   : > { %1446 = dma.done.wait [#allocation3 + $0xc], 16 }
  0xd7   : > { %1447 = vsyncadd [#allocation3 + $0xc], 4294967280 }
  0xd8   : > { %1448 = dma.done.wait [#allocation3 + $0xd], 16 }
  0xd9   : > { %1449 = vsyncadd [#allocation3 + $0xd], 4294967280 }
  0xda   : > { %1450 = dma.done.wait [#allocation3 + $0xe], 16 }
  0xdb   : > { %1451 = vsyncadd [#allocation3 + $0xe], 4294967280 }
  0xdc   : > { %1452 = dma.done.wait [#allocation3 + $0xf], 16 }
  0xdd   : > { %1453 = vsyncadd [#allocation3 + $0xf], 4294967280  ;;  %s1321_s29 = sshll.u32 %s1522_s20, 8  ;;  %s943_s30 = sshll.u32 %s1559_s8, 4  ;;  %v918_v16 = vld [vmem:[#allocation2] sm:$0xff]  ;;  %v919_v18 = vld [vmem:[#allocation2 + $0x8] sm:$0xff]  ;;  %s1634_s30 = int_to_ptr.vmem [resolvable:$true] %s943_s30 }
  0xde   : > { %v922_v17 = vld [vmem:[%s1683_s2] sm:$0xff]  ;;  %v920_v19 = vmul.f32 5.656854, %v918_v16  ;;  %v921_v20 = vmul.f32 5.656854, %v919_v18  ;;  %v923_v21 = vld [vmem:[%s1683_s2 + $0x8] sm:$0xff]  ;;  %s1632_s11 = scalar_lea.hbm %s1684_s3, %s1321_s29 }
  0xdf   : > { %vm926_vm0 = vcmask 261120   ;;  %s1640_s20 = scalar_lea.sflag [#allocation7], %s100_s28  ;;  %s1376_s12 = scalar_lea.vmem %s1634_s30, 256 }
  0xe0   : > { %v924_v22 = vadd.f32 %v922_v17, %v920_v19  ;;  %v925_v23 = vadd.f32 %v923_v21, %v921_v20  ;;  %p1377_p1 = scmp.ne.s32.totalorder %s1634_s30, %s1376_s12  ;;  %s1475_s13 = smov [#allocation6]  }
  0xe1   : > { %s1380_s14 = sshll.u32 %s1475_s13, 4  ;;  %s1381_s14 = int_to_ptr.vmem [resolvable:$false] %s1380_s14 }
  0xe2   : > { %927 = vst.msk [vmem:[%s1559_s8] sm:$0xff] %vm926_vm0, %v924_v22  ;;  %928 = vst.msk [vmem:[%s1559_s8 + $0x8] sm:$0xff] %vm926_vm0, %v925_v23  ;;  %p1378_p2 = pnand %p1377_p1, %p1539_p10  ;;  %s1382_s15 = scalar_lea.vmem %s1381_s14, 512 }
  0xe3   : > { %p1383_p4 = scmp.lt.s32.totalorder %s1634_s30, %s1381_s14  ;;  %p1384_p5 = scmp.lt.s32.totalorder %s1382_s15, %s1376_s12 }
  0xe4   : > { %p1379_p3 = pneg %p1378_p2 }
  0xe5   : > { %p1385_p6 = por %p1384_p5, %p1383_p4 }
  0xe7   : > { %p1386_p7 = pnand %p1385_p6, %p1379_p3 }
  0xe9   : > { %1389 = shalt.err (!%p1386_p7)
}
  0xea   : > { %s1390_s28 = scalar_lea.hbm %s1632_s11, 256  ;;  %s1394_s21 = scalar_lea.hbm %s1684_s3, 512 }
  0xeb   : > { %p1391_p8 = scmp.ne.s32.totalorder %s1632_s11, %s1390_s28  ;;  %p1395_p13 = scmp.lt.u32.totalorder %s1632_s11, %s1684_s3 }
  0xec   : > { %p1396_p0 = scmp.lt.u32.totalorder %s1394_s21, %s1390_s28  ;;  %p1398_p2 = scmp.lt.u32.totalorder %s1390_s28, %s1632_s11 }
  0xed   : > { %p1392_p9 = pnand %p1391_p8, %p1539_p10 }
  0xee   : > { %p1397_p1 = por %p1396_p0, %p1395_p13 }
  0xef   : > { %p1393_p12 = pneg %p1392_p9 }
  0xf0   : > { %p1399_p3 = por %p1398_p2, %p1397_p1 }
  0xf2   : > { %p1400_p4 = pnand %p1399_p3, %p1393_p12 }
  0xf4   : > { %1403 = shalt.err (!%p1400_p4)
}
  0xf5   : > { %s1476_s29 = smov 128   ;;  %s1477_s4 = smov 8  }
  0xf6   : > { %1322 = dma.vmem_to_hbm [thread:$0]  (%p1539_p10), %s1634_s30, 256, %s1632_s11, %s1640_s20, %s1476_s29, %s1476_s29, %s1477_s4  }
  0xf7 PF: > { %p1328_p5 = scmp.ge.s32.totalorder %s1472_s19, 2  ;;  %s958_s5 = sand.u32 1, %s1460_s17  }
  0xf8   : > { %s959_s6 = scalar_lea.sflag [#allocation7], %s958_s5 }
  0xf9   : > { %p1325_p6 = pnand %p1328_p5, %p1543_p11 }
  0xfb   : > { %1455 = dma.done.wait (!%p1325_p6), %s959_s6, 256  }
  0xfc   : > { %1457 = vsyncadd (!%p1325_p6), %s959_s6, 4294967040  ;;  %p19_p7 = scmp.ge.s32.totalorder %s1526_s22, 4   ;;  %s1687_s17 = smov %s1464_s18 }
  0xfd   : > { %s1688_s18 = smov %s1468_s0  ;;  %s1689_s0 = smov %s1537_s25 }
  0xfe   : > { %s1690_s19 = smov %s1526_s22  ;;  %21 = sbr.rel (!%p19_p7) target bundleno = 18 (0x12), region = 757 }
 0x105   :  { %964 = vsyncpa [#allocation7], 1 }
 0x106   :  { %966 = vsyncpa [#allocation7 + $0x1], 1 }
 0x107   :  { %967 = vsyncmov [#allocation3] }
 0x10a   :  { %s968_s19 = vpop.sfrf %967 }
 0x10b   :  { %p1305_p10 = scmp.ne.s32.totalorder %s968_s19, 0 }
 0x10d   :  { %972 = shalt.err (%p1305_p10)  }
 0x10e   :  { %974 = vsyncmov [#allocation3 + $0x1] }
 0x111   :  { %s975_s26 = vpop.sfrf %974 }
 0x112   :  { %p1306_p11 = scmp.ne.s32.totalorder %s975_s26, 0 }
 0x114   :  { %979 = shalt.err (%p1306_p11)  }
 0x115   :  { %981 = vsyncmov [#allocation3 + $0x2] }
 0x118   :  { %s982_s27 = vpop.sfrf %981 }
 0x119   :  { %p1307_p8 = scmp.ne.s32.totalorder %s982_s27, 0 }
 0x11b   :  { %986 = shalt.err (%p1307_p8)  }
 0x11c   :  { %988 = vsyncmov [#allocation3 + $0x3] }
 0x11f   :  { %s989_s30 = vpop.sfrf %988 }
 0x120   :  { %p1308_p9 = scmp.ne.s32.totalorder %s989_s30, 0 }
 0x122   :  { %993 = shalt.err (%p1308_p9)  }
 0x123   :  { %995 = vsyncmov [#allocation3 + $0x4] }
 0x126   :  { %s996_s22 = vpop.sfrf %995 }
 0x127   :  { %p1309_p12 = scmp.ne.s32.totalorder %s996_s22, 0 }
 0x129   :  { %1000 = shalt.err (%p1309_p12)  }
 0x12a   :  { %1002 = vsyncmov [#allocation3 + $0x5] }
 0x12d   :  { %s1003_s1 = vpop.sfrf %1002 }
 0x12e   :  { %p1310_p13 = scmp.ne.s32.totalorder %s1003_s1, 0 }
 0x130   :  { %1007 = shalt.err (%p1310_p13)  }
 0x131   :  { %1009 = vsyncmov [#allocation3 + $0x6] }
 0x134   :  { %s1010_s2 = vpop.sfrf %1009 }
 0x135   :  { %p1311_p0 = scmp.ne.s32.totalorder %s1010_s2, 0 }
 0x137   :  { %1014 = shalt.err (%p1311_p0)  }
 0x138   :  { %1016 = vsyncmov [#allocation3 + $0x7] }
 0x13b   :  { %s1017_s3 = vpop.sfrf %1016 }
 0x13c   :  { %p1312_p1 = scmp.ne.s32.totalorder %s1017_s3, 0 }
 0x13e   :  { %1021 = shalt.err (%p1312_p1)  }
 0x13f   :  { %1023 = vsyncmov [#allocation3 + $0x8] }
 0x142   :  { %s1024_s17 = vpop.sfrf %1023 }
 0x143   :  { %p1313_p2 = scmp.ne.s32.totalorder %s1024_s17, 0 }
 0x145   :  { %1028 = shalt.err (%p1313_p2)  }
 0x146   :  { %1030 = vsyncmov [#allocation3 + $0x9] }
 0x149   :  { %s1031_s18 = vpop.sfrf %1030 }
 0x14a   :  { %p1314_p3 = scmp.ne.s32.totalorder %s1031_s18, 0 }
 0x14c   :  { %1035 = shalt.err (%p1314_p3)  }
 0x14d   :  { %1037 = vsyncmov [#allocation3 + $0xa] }
 0x150   :  { %s1038_s0 = vpop.sfrf %1037 }
 0x151   :  { %p1315_p4 = scmp.ne.s32.totalorder %s1038_s0, 0 }
 0x153   :  { %1042 = shalt.err (%p1315_p4)  }
 0x154   :  { %1044 = vsyncmov [#allocation3 + $0xb] }
 0x157   :  { %s1045_s25 = vpop.sfrf %1044 }
 0x158   :  { %p1316_p5 = scmp.ne.s32.totalorder %s1045_s25, 0 }
 0x15a   :  { %1049 = shalt.err (%p1316_p5)  }
 0x15b   :  { %1051 = vsyncmov [#allocation3 + $0xc] }
 0x15e   :  { %s1052_s7 = vpop.sfrf %1051 }
 0x15f   :  { %p1317_p6 = scmp.ne.s32.totalorder %s1052_s7, 0 }
 0x161   :  { %1056 = shalt.err (%p1317_p6)  }
 0x162   :  { %1058 = vsyncmov [#allocation3 + $0xd] }
 0x165   :  { %s1059_s9 = vpop.sfrf %1058 }
 0x166   :  { %p1318_p7 = scmp.ne.s32.totalorder %s1059_s9, 0 }
 0x168   :  { %1063 = shalt.err (%p1318_p7)  }
 0x169   :  { %1065 = vsyncmov [#allocation3 + $0xe] }
 0x16c   :  { %s1066_s10 = vpop.sfrf %1065 }
 0x16d   :  { %p1319_p10 = scmp.ne.s32.totalorder %s1066_s10, 0 }
 0x16f   :  { %1070 = shalt.err (%p1319_p10)  }
 0x170   :  { %1072 = vsyncmov [#allocation3 + $0xf] }
 0x173   :  { %s1073_s11 = vpop.sfrf %1072 }
 0x174   :  { %p1320_p11 = scmp.ne.s32.totalorder %s1073_s11, 0 }
 0x176   :  { %1077 = shalt.err (%p1320_p11)  }

</bundles_post_ra>
